<compile_context>
chip_gen: v6e
topology: v6e:2x2x1
jax: 0.10.0
libtpu: 0.0.40
codegen_flags: <defaults>
</compile_context>

<pallas_src>
import math

import jax
import jax.numpy as jnp
from jax.experimental import pallas as pl
from jax.experimental.pallas import tpu as pltpu

LOGIT_SCALE_MAX = math.log(1.0 / 0.01)


# ----------------------------------------------------------------------------
# Kernel 1: CPB MLP  (Linear(2,512,bias) -> ReLU -> Linear(512,Hp,no bias))
#           fused with the 16*sigmoid() epilogue.
# ----------------------------------------------------------------------------
def cpb_mlp_kernel(x_ref, w1_ref, b1_ref, w2_ref, o_ref):
    x = x_ref[...]                       # (tm, C), C == 2
    w1 = w1_ref[...]                     # (C, Hdn)
    # Degenerate K=2 contraction -> lane-broadcast FMAs on the VPU.
    h = b1_ref[...]                      # (1, Hdn)
    for c in range(x.shape[1]):          # static unroll, C == 2
        h = h + x[:, c:c + 1] * w1[c:c + 1, :]
    h = jnp.maximum(h, 0.0)              # ReLU (inplace=True in torch -> same values)
    o = jnp.dot(h, w2_ref[...], preferred_element_type=jnp.float32)
    o_ref[...] = (16.0 * jax.nn.sigmoid(o)).astype(o_ref.dtype)


def cpb_mlp_pallas(x2d, w1, b1, w2, *, tm=256):
    """x2d: (T, 2), w1: (2, Hdn), b1: (1, Hdn), w2: (Hdn, Op) -> (Tp, Op) of 16*sigmoid(MLP)."""
    T, C = x2d.shape
    Hdn = w1.shape[1]
    Op = w2.shape[1]

    # Pad rows instead of asserting divisibility (ragged last tile).
    Tp = -(-T // tm) * tm
    if Tp != T:
        x2d = jnp.pad(x2d, ((0, Tp - T), (0, 0)))

    cost = pl.CostEstimate(
        flops=2 * Tp * (C * Hdn + Hdn * Op),
        transcendentals=Tp * Op,
        bytes_accessed=(Tp * C + C * Hdn + Hdn + Hdn * Op + Tp * Op) * 4,
    )
    return pl.pallas_call(
        cpb_mlp_kernel,
        out_shape=jax.ShapeDtypeStruct((Tp, Op), x2d.dtype),
        grid_spec=pltpu.PrefetchScalarGridSpec(
            num_scalar_prefetch=0,
            grid=(Tp // tm,),
            in_specs=[
                pl.BlockSpec((tm, C), lambda i: (i, 0)),     # coords row tile
                pl.BlockSpec((C, Hdn), lambda i: (0, 0)),    # W1 (resident)
                pl.BlockSpec((1, Hdn), lambda i: (0, 0)),    # b1
                pl.BlockSpec((Hdn, Op), lambda i: (0, 0)),   # W2 (resident, lane-dense Op)
            ],
            out_specs=pl.BlockSpec((tm, Op), lambda i: (i, 0)),
        ),
        compiler_params=pltpu.CompilerParams(
            dimension_semantics=("parallel",),
        ),
        cost_estimate=cost,
    )(x2d, w1, b1, w2)


# ----------------------------------------------------------------------------
# Kernel 2: fused affine transform, pure VPU FMA on a (rows, L) view
#   out[r, :] = attn[r, :] * scale_rows[r % P] + addend[r % P, :]
# ----------------------------------------------------------------------------
def affine_kernel(scale_ref, attn_ref, add_ref, o_ref):
    a = attn_ref[...].astype(jnp.float32)
    out = a * scale_ref[...] + add_ref[...]
    o_ref[...] = out.astype(o_ref.dtype)


def _pick_row_tile(period, total_rows, lane_dim, itemsize=4,
                   vmem_budget=24 * 1024 * 1024):
    """Largest multiple-of-8 divisor of `period` fitting VMEM; None if none exists."""
    max_tm = max(8, vmem_budget // (6 * lane_dim * itemsize))
    cands = [d for d in range(8, min(period, max_tm) + 1, 8) if period % d == 0]
    if not cands:
        return None
    # Prefer the largest tile that still leaves >= 8 grid steps (pipelining /
    # megacore sharding); otherwise the smallest candidate (maximise step count).
    good = [d for d in cands if total_rows // d >= 8]
    return max(good) if good else min(cands)


def affine_pallas(attn2, addend2, scale_rows, *, period, tm):
    """attn2: (R, Lp), addend2: (P, Lp) f32, scale_rows: (P, 1) f32, P | R, tm | P."""
    R, Lp = attn2.shape
    P = period
    assert R % P == 0 and P % tm == 0
    n_rb = P // tm
    n_g = R // P

    itemsize = attn2.dtype.itemsize
    block_bytes = tm * Lp * max(itemsize, 4)
    # residents + double-buffered attn in/out + addend + slack; <= 32 MiB (v7x-safe).
    vmem_limit = min(32 * 1024 * 1024, 6 * block_bytes + (4 << 20))

    cost = pl.CostEstimate(
        flops=2 * R * Lp,
        transcendentals=0,
        bytes_accessed=2 * R * Lp * itemsize + (P * Lp + P) * 4,
    )
    return pl.pallas_call(
        affine_kernel,
        out_shape=jax.ShapeDtypeStruct((R, Lp), attn2.dtype),
        grid_spec=pltpu.PrefetchScalarGridSpec(
            num_scalar_prefetch=0,
            # Row-block axis outer, group axis inner: addend/scale block indices
            # depend only on the outer axis, so their DMAs are elided across the
            # inner loop and attn is the only per-step HBM stream.
            grid=(n_rb, n_g),
            in_specs=[
                pl.BlockSpec((tm, 1), lambda rb, g: (rb, 0)),               # scale per row
                pl.BlockSpec((tm, Lp), lambda rb, g: (g * n_rb + rb, 0)),   # attn tile
                pl.BlockSpec((tm, Lp), lambda rb, g: (rb, 0)),              # addend tile
            ],
            out_specs=pl.BlockSpec((tm, Lp), lambda rb, g: (g * n_rb + rb, 0)),
        ),
        compiler_params=pltpu.CompilerParams(
            dimension_semantics=("parallel", "parallel"),
            vmem_limit_bytes=vmem_limit,
        ),
        cost_estimate=cost,
        input_output_aliases={1: 0},   # output reuses attn's HBM buffer
    )(scale_rows, attn2, addend2)


# ----------------------------------------------------------------------------
# Full forward, matching AffineTransform.forward
# ----------------------------------------------------------------------------
def affine_transform_forward(attn, coords_table, rel_pos_index, mask,
                             logit_scale, w1, b1, w2):
    B_, H, N1, N2 = attn.shape
    L = N1 * N2
    R = B_ * H

    # 1) CPB MLP + fused 16*sigmoid on the relative coords table (Pallas).
    coords2d = coords_table.reshape(-1, coords_table.shape[-1]).astype(jnp.float32)
    T = coords2d.shape[0]
    Hp = -(-H // 128) * 128                          # lane-dense padded head dim
    w2p = jnp.zeros((w2.shape[0], Hp), jnp.float32).at[:, :H].set(w2.astype(jnp.float32))
    bias16_table = cpb_mlp_pallas(
        coords2d, w1.astype(jnp.float32),
        b1.reshape(1, -1).astype(jnp.float32), w2p)[:T, :H]        # (T, H), already 16*sigmoid

    # 2) Gather by relative_position_index, permute to (H, N1*N2).
    # TODO(synk): data-dependent row gather kept in JAX (jnp.take); a Pallas version
    #             would need scalar-prefetch + pl.Element-indexed DMA and is not worth
    #             it for this ~225-row table.
    bias16 = jnp.take(bias16_table, rel_pos_index.reshape(-1), axis=0)        # (L, H)
    bias16 = jnp.transpose(bias16.reshape(N1, N2, H), (2, 0, 1)).reshape(H, L)

    # Per-head scale, hoisted out of the streaming kernel (H scalars).
    scale_h = jnp.exp(jnp.minimum(
        logit_scale.reshape(H).astype(jnp.float32), LOGIT_SCALE_MAX))         # (H,)

    # 3) Fold mask (if any) into the per-row additive term: period P = nW*H (or H).
    if mask is None:
        addend = bias16                                                       # (H, L)
        scale_rows = scale_h.reshape(H, 1)
    else:
        nW = mask.shape[0]
        assert B_ % nW == 0
        maskL = mask.reshape(nW, 1, L).astype(jnp.float32)
        addend = (bias16[None, :, :] + maskL).reshape(nW * H, L)              # (nW*H, L)
        scale_rows = jnp.tile(scale_h, (nW,)).reshape(nW * H, 1)
    P = addend.shape[0]

    # 4) Lane-dense padding of the token-pair dim (keeps stores unmasked vst).
    Lp = -(-L // 128) * 128
    attn2 = attn.reshape(R, L)
    if Lp != L:
        attn2 = jnp.pad(attn2, ((0, 0), (0, Lp - L)))
        addend = jnp.pad(addend, ((0, 0), (0, Lp - L)))

    # 5) Pick a multiple-of-8 row tile aligned to the addend period.
    tm = _pick_row_tile(P, R, Lp)
    rows = R
    if tm is None:
        # Awkward period (no multiple-of-8 divisor): broadcast the addend to all
        # rows and pad the row count to a multiple of 8.
        addend = jnp.tile(addend, (R // P, 1))
        scale_rows = jnp.tile(scale_rows, (R // P, 1))
        rows = -(-R // 8) * 8
        if rows != R:
            attn2 = jnp.pad(attn2, ((0, rows - R), (0, 0)))
            addend = jnp.pad(addend, ((0, rows - R), (0, 0)))
            scale_rows = jnp.pad(scale_rows, ((0, rows - R), (0, 0)))
        P = rows
        tm = _pick_row_tile(P, rows, Lp)

    out2 = affine_pallas(attn2, addend, scale_rows, period=P, tm=tm)
    if rows != R or Lp != L:
        out2 = out2[:R, :L]
    return out2.reshape(B_, H, N1, N2)


# ----------------------------------------------------------------------------
# Pure-JAX reference (mirrors the torch module)
# ----------------------------------------------------------------------------
def affine_reference(attn, coords_table, rel_pos_index, mask, logit_scale, w1, b1, w2):
    B_, H, N1, N2 = attn.shape
    scale = jnp.exp(jnp.minimum(logit_scale, LOGIT_SCALE_MAX))          # (H,1,1)
    attn = attn * scale
    coords2d = coords_table.reshape(-1, coords_table.shape[-1])
    bt = jnp.maximum(coords2d @ w1 + b1, 0.0) @ w2                      # (T, H)
    bias = bt[rel_pos_index.reshape(-1)].reshape(N1, N2, H)
    bias = jnp.transpose(bias, (2, 0, 1))
    bias = 16.0 * jax.nn.sigmoid(bias)
    attn = attn + bias[None]
    if mask is not None:
        nW = mask.shape[0]
        attn = attn.reshape(B_ // nW, nW, H, N1, N2) + mask[None, :, None]
        attn = attn.reshape(-1, H, N1, N2)
    return attn


if __name__ == "__main__":
    # Small shapes consistent with a windowed-attention block.
    num_heads = 4
    Wh = Ww = 8
    N1 = N2 = Wh * Ww                      # 64 tokens per window -> L = 4096 (lane-dense)
    nW = 4                                 # number of windows (mask groups)
    batch = 2
    B_ = batch * nW                        # 8
    Tbl = (2 * Wh - 1) * (2 * Ww - 1)      # 225 relative-coord entries
    hidden = 512                           # CPB_MLP hidden channels

    key = jax.random.PRNGKey(0)
    k = jax.random.split(key, 7)

    attn = jax.random.normal(k[0], (B_, num_heads, N1, N2), dtype=jnp.float32)
    coords_table = jax.random.normal(k[1], (1, 2 * Wh - 1, 2 * Ww - 1, 2), dtype=jnp.float32)
    rel_pos_index = jax.random.randint(k[2], (N1, N2), 0, Tbl)
    mask = jnp.where(jax.random.uniform(k[3], (nW, N1, N2)) > 0.5, 0.0, -100.0).astype(jnp.float32)

    # Parameters (torch nn.Linear weights stored transposed: (in, out)).
    logit_scale = jnp.log(10.0 * jnp.ones((num_heads, 1, 1), dtype=jnp.float32))
    w1 = jax.random.normal(k[4], (2, hidden), dtype=jnp.float32) * 0.1
    b1 = jax.random.normal(k[5], (1, hidden), dtype=jnp.float32) * 0.1
    w2 = jax.random.normal(k[6], (hidden, num_heads), dtype=jnp.float32) * 0.1

    # Reference first (the Pallas call aliases its output with the attn input buffer).
    y_ref = affine_reference(attn, coords_table, rel_pos_index, mask,
                             logit_scale, w1, b1, w2)
    y_ref_nomask = affine_reference(attn, coords_table, rel_pos_index, None,
                                    logit_scale, w1, b1, w2)

    fwd = jax.jit(affine_transform_forward)

    y = jax.block_until_ready(fwd(attn, coords_table, rel_pos_index, mask,
                                  logit_scale, w1, b1, w2))
    assert y.shape == (B_, num_heads, N1, N2)
    assert jnp.allclose(y, y_ref, atol=1e-4, rtol=1e-4), \
        f"mismatch (mask) vs reference, max err = {float(jnp.max(jnp.abs(y - y_ref)))}"

    # Also exercise the mask=None path (no zero mask is materialized or streamed).
    y2 = jax.block_until_ready(fwd(attn, coords_table, rel_pos_index, None,
                                   logit_scale, w1, b1, w2))
    assert jnp.allclose(y2, y_ref_nomask, atol=1e-4, rtol=1e-4), \
        f"mismatch (no mask) vs reference, max err = {float(jnp.max(jnp.abs(y2 - y_ref_nomask)))}"

    print("KERNEL_OK")
</pallas_src>

<mosaic_0001>
module attributes {stable_mosaic.version = 11 : i64} {
  func.func @cpb_mlp_kernel(%arg0: i32, %arg1: memref<256x2xf32, #tpu.memory_space<vmem>>, %arg2: memref<2x512xf32, #tpu.memory_space<vmem>>, %arg3: memref<1x512xf32, #tpu.memory_space<vmem>>, %arg4: memref<512x128xf32, #tpu.memory_space<vmem>>, %arg5: memref<256x128xf32, #tpu.memory_space<vmem>>) attributes {dimension_semantics = [#tpu.dimension_semantics<parallel>], iteration_bounds = array<i64: 1>, scalar_prefetch = 0 : i64, scratch_operands = 0 : i64, tpu.core_type = #tpu.core_type<tc>, window_params = [{transform_indices = @transform_0, window_bounds = array<i64: 256, 2>}, {pipeline_mode = #tpu.pipeline_mode<synchronous>, transform_indices = @transform_1, window_bounds = array<i64: 2, 512>}, {pipeline_mode = #tpu.pipeline_mode<synchronous>, transform_indices = @transform_2, window_bounds = array<i64: 1, 512>}, {pipeline_mode = #tpu.pipeline_mode<synchronous>, transform_indices = @transform_3, window_bounds = array<i64: 512, 128>}, {transform_indices = @transform_4, window_bounds = array<i64: 256, 128>}]} {
    %c0 = arith.constant 0 : index
    %c0_0 = arith.constant 0 : index
    %0 = vector.load %arg1[%c0, %c0_0] : memref<256x2xf32, #tpu.memory_space<vmem>>, vector<256x2xf32>
    %c0_1 = arith.constant 0 : index
    %c0_2 = arith.constant 0 : index
    %1 = vector.load %arg2[%c0_1, %c0_2] : memref<2x512xf32, #tpu.memory_space<vmem>>, vector<2x512xf32>
    %c0_3 = arith.constant 0 : index
    %c0_4 = arith.constant 0 : index
    %2 = vector.load %arg3[%c0_3, %c0_4] : memref<1x512xf32, #tpu.memory_space<vmem>>, vector<1x512xf32>
    %3 = vector.extract_strided_slice %0 {offsets = [0, 0], sizes = [256, 1], strides = [1, 1]} : vector<256x2xf32> to vector<256x1xf32>
    %4 = vector.extract_strided_slice %1 {offsets = [0, 0], sizes = [1, 512], strides = [1, 1]} : vector<2x512xf32> to vector<1x512xf32>
    %5 = vector.broadcast %3 : vector<256x1xf32> to vector<256x512xf32>
    %6 = vector.broadcast %4 : vector<1x512xf32> to vector<256x512xf32>
    %7 = arith.mulf %5, %6 : vector<256x512xf32>
    %8 = vector.broadcast %2 : vector<1x512xf32> to vector<256x512xf32>
    %9 = arith.addf %8, %7 : vector<256x512xf32>
    %10 = vector.extract_strided_slice %0 {offsets = [0, 1], sizes = [256, 1], strides = [1, 1]} : vector<256x2xf32> to vector<256x1xf32>
    %11 = vector.extract_strided_slice %1 {offsets = [1, 0], sizes = [1, 512], strides = [1, 1]} : vector<2x512xf32> to vector<1x512xf32>
    %12 = vector.broadcast %10 : vector<256x1xf32> to vector<256x512xf32>
    %13 = vector.broadcast %11 : vector<1x512xf32> to vector<256x512xf32>
    %14 = arith.mulf %12, %13 : vector<256x512xf32>
    %15 = arith.addf %9, %14 : vector<256x512xf32>
    %cst = arith.constant 0.000000e+00 : f32
    %16 = vector.broadcast %cst : f32 to vector<256x512xf32>
    %17 = arith.maximumf %15, %16 : vector<256x512xf32>
    %c0_5 = arith.constant 0 : index
    %c0_6 = arith.constant 0 : index
    %18 = vector.load %arg4[%c0_5, %c0_6] : memref<512x128xf32, #tpu.memory_space<vmem>>, vector<512x128xf32>
    %cst_7 = arith.constant dense<0.000000e+00> : vector<256x128xf32>
    %19 = tpu.matmul %17, %18, %cst_7 {dimension_numbers = #tpu.dot_dimension_numbers<[1], [0], [0], [1], [0, 0, 1, 1], [], []>} : vector<256x512xf32>, vector<512x128xf32>, vector<256x128xf32> -> vector<256x128xf32>
    %20 = arith.negf %19 : vector<256x128xf32>
    %21 = math.exp %20 : vector<256x128xf32>
    %cst_8 = arith.constant 1.000000e+00 : f32
    %22 = vector.broadcast %cst_8 : f32 to vector<256x128xf32>
    %23 = arith.addf %22, %21 : vector<256x128xf32>
    %24 = arith.divf %22, %23 : vector<256x128xf32>
    %cst_9 = arith.constant 1.600000e+01 : f32
    %25 = vector.broadcast %cst_9 : f32 to vector<256x128xf32>
    %26 = arith.mulf %25, %24 : vector<256x128xf32>
    %c0_10 = arith.constant 0 : index
    %c0_11 = arith.constant 0 : index
    %27 = vector.load %arg5[%c0_10, %c0_11] : memref<256x128xf32, #tpu.memory_space<vmem>>, vector<256x128xf32>
    tpu.vector_store %arg5[%c0_10, %c0_11], %26 {strides = array<i32>} : memref<256x128xf32, #tpu.memory_space<vmem>>, vector<256x128xf32>,
    return
  }
  func.func @transform_0(%arg0: i32) -> (i32, i32) {
    %c0_i32 = arith.constant 0 : i32
    %c0_i32_0 = arith.constant 0 : i32
    return %arg0, %c0_i32 : i32, i32
  }
  func.func @transform_1(%arg0: i32) -> (i32, i32) {
    %c0_i32 = arith.constant 0 : i32
    %c0_i32_0 = arith.constant 0 : i32
    %c0_i32_1 = arith.constant 0 : i32
    return %c0_i32, %c0_i32_0 : i32, i32
  }
  func.func @transform_2(%arg0: i32) -> (i32, i32) {
    %c0_i32 = arith.constant 0 : i32
    %c0_i32_0 = arith.constant 0 : i32
    %c0_i32_1 = arith.constant 0 : i32
    return %c0_i32, %c0_i32_0 : i32, i32
  }
  func.func @transform_3(%arg0: i32) -> (i32, i32) {
    %c0_i32 = arith.constant 0 : i32
    %c0_i32_0 = arith.constant 0 : i32
    %c0_i32_1 = arith.constant 0 : i32
    return %c0_i32, %c0_i32_0 : i32, i32
  }
  func.func @transform_4(%arg0: i32) -> (i32, i32) {
    %c0_i32 = arith.constant 0 : i32
    %c0_i32_0 = arith.constant 0 : i32
    return %arg0, %c0_i32 : i32, i32
  }
}

module attributes {stable_mosaic.version = 11 : i64} {
  func.func @affine_kernel(%arg0: i32, %arg1: i32, %arg2: memref<8x1xf32, #tpu.memory_space<vmem>>, %arg3: memref<8x4096xf32, #tpu.memory_space<vmem>>, %arg4: memref<8x4096xf32, #tpu.memory_space<vmem>>, %arg5: memref<8x4096xf32, #tpu.memory_space<vmem>>) attributes {dimension_semantics = [#tpu.dimension_semantics<parallel>, #tpu.dimension_semantics<parallel>], iteration_bounds = array<i64: 2, 2>, scalar_prefetch = 0 : i64, scratch_operands = 0 : i64, tpu.core_type = #tpu.core_type<tc>, window_params = [{transform_indices = @transform_0, window_bounds = array<i64: 8, 1>}, {transform_indices = @transform_1, window_bounds = array<i64: 8, 4096>}, {transform_indices = @transform_2, window_bounds = array<i64: 8, 4096>}, {transform_indices = @transform_3, window_bounds = array<i64: 8, 4096>}]} {
    %c0 = arith.constant 0 : index
    %c0_0 = arith.constant 0 : index
    %0 = vector.load %arg3[%c0, %c0_0] : memref<8x4096xf32, #tpu.memory_space<vmem>>, vector<8x4096xf32>
    %c0_1 = arith.constant 0 : index
    %c0_2 = arith.constant 0 : index
    %1 = vector.load %arg2[%c0_1, %c0_2] : memref<8x1xf32, #tpu.memory_space<vmem>>, vector<8x1xf32>
    %2 = vector.broadcast %1 : vector<8x1xf32> to vector<8x4096xf32>
    %3 = arith.mulf %0, %2 : vector<8x4096xf32>
    %c0_3 = arith.constant 0 : index
    %c0_4 = arith.constant 0 : index
    %4 = vector.load %arg4[%c0_3, %c0_4] : memref<8x4096xf32, #tpu.memory_space<vmem>>, vector<8x4096xf32>
    %5 = arith.addf %3, %4 : vector<8x4096xf32>
    %c0_5 = arith.constant 0 : index
    %c0_6 = arith.constant 0 : index
    %6 = vector.load %arg5[%c0_5, %c0_6] : memref<8x4096xf32, #tpu.memory_space<vmem>>, vector<8x4096xf32>
    tpu.vector_store %arg5[%c0_5, %c0_6], %5 {strides = array<i32>} : memref<8x4096xf32, #tpu.memory_space<vmem>>, vector<8x4096xf32>,
    return
  }
  func.func @transform_0(%arg0: i32, %arg1: i32) -> (i32, i32) {
    %c0_i32 = arith.constant 0 : i32
    %c0_i32_0 = arith.constant 0 : i32
    return %arg0, %c0_i32 : i32, i32
  }
  func.func @transform_1(%arg0: i32, %arg1: i32) -> (i32, i32) {
    %c2_i32 = arith.constant 2 : i32
    %0 = arith.muli %arg1, %c2_i32 : i32
    %1 = arith.addi %0, %arg0 : i32
    %c0_i32 = arith.constant 0 : i32
    %c0_i32_0 = arith.constant 0 : i32
    return %1, %c0_i32 : i32, i32
  }
  func.func @transform_2(%arg0: i32, %arg1: i32) -> (i32, i32) {
    %c0_i32 = arith.constant 0 : i32
    %c0_i32_0 = arith.constant 0 : i32
    return %arg0, %c0_i32 : i32, i32
  }
  func.func @transform_3(%arg0: i32, %arg1: i32) -> (i32, i32) {
    %c2_i32 = arith.constant 2 : i32
    %0 = arith.muli %arg1, %c2_i32 : i32
    %1 = arith.addi %0, %arg0 : i32
    %c0_i32 = arith.constant 0 : i32
    %c0_i32_0 = arith.constant 0 : i32
    return %1, %c0_i32 : i32, i32
  }
}

</mosaic_0001>

<bundles_post_ra>
// kernel: affine_transform_forward.2
= control target key start
LH: loop header
LB: loop body
LE: loop exit
PB: predicated region body
PF: predicated region fallthrough
CT: control target
= control target key end

     0   :  { %9 = vsyncpa [#allocation3], 0  ;;  %s3324_s0 = inlined_call_operand.vmem [shape: f32[256,2], index: 0, kind: input, shape index: {}]   ;;  %s3325_s1 = inlined_call_operand.hbm [shape: f32[2,512], index: 1, kind: input, shape index: {}]   ;;  %s3326_s2 = inlined_call_operand.hbm [shape: f32[1,512], index: 2, kind: input, shape index: {}]   ;;  %s3327_s3 = inlined_call_operand.vmem [shape: f32[512,128], index: 3, kind: input, shape index: {}]   ;;  %s3328_s4 = inlined_call_operand.vmem [shape: f32[256,128], index: 4, kind: output, shape index: {}]  }
   0x1   :  { %10 = vsyncpa [#allocation5], 0  ;;  %s2087_s15 = smov [#allocation2]   ;;  %s2088_s17 = smov [#allocation4]  }
   0x2   :  { %s19_s16 = sshll.u32 %s2087_s15, 4  ;;  %s29_s18 = sshll.u32 %s2088_s17, 4  ;;  %s20_s16 = int_to_ptr.vmem [resolvable:$true] %s19_s16  ;;  %s30_s18 = int_to_ptr.vmem [resolvable:$true] %s29_s18 }
   0x3   :  { %s2051_s19 = scalar_lea.vmem %s20_s16, 128  ;;  %p2056_p1 = scmp.lt.s32.totalorder %s20_s16, %s20_s16 }
   0x4   :  { %p2052_p0 = scmp.ne.s32.totalorder %s20_s16, %s2051_s19  ;;  %p2057_p2 = scmp.lt.s32.totalorder %s2051_s19, %s2051_s19 }
   0x6   :  { %p2058_p3 = por %p2057_p2, %p2056_p1 }
   0x8   :  { %p2059_p4 = pnand %p2058_p3, %p2052_p0 }
   0xa   :  { %2062 = shalt.err (!%p2059_p4)
}
   0xb   :  { %22 = dma.hbm_to_vmem [thread:$0]  %s3325_s1, 128, %s20_s16, [#allocation3]  }
   0xc   :  { %s2071_s22 = scalar_lea.vmem %s30_s18, 64  ;;  %p2076_p6 = scmp.lt.s32.totalorder %s30_s18, %s30_s18 }
   0xd   :  { %p2072_p5 = scmp.ne.s32.totalorder %s30_s18, %s2071_s22  ;;  %p2077_p7 = scmp.lt.s32.totalorder %s2071_s22, %s2071_s22 }
   0xf   :  { %p2078_p8 = por %p2077_p7, %p2076_p6 }
  0x11   :  { %p2079_p9 = pnand %p2078_p8, %p2072_p5 }
  0x13   :  { %2082 = shalt.err (!%p2079_p9)
}
  0x14   :  { %32 = dma.hbm_to_vmem [thread:$0]  %s3326_s2, 64, %s30_s18, [#allocation5]  }
  0x15   :  { %2083 = dma.done.wait [#allocation3], 128  }
  0x16   :  { %2084 = vsyncadd [#allocation3], 4294967168 }
  0x17   :  { %2085 = dma.done.wait [#allocation5], 64  }
  0x18   :  { %2086 = vsyncadd [#allocation5], 4294967232  ;;  %v2089_v0 = vmov 0   ;;  %v2090_v1 = vmov 0.0   ;;  %v42_v2 = vld [vmem:[%s3324_s0 + $0x8] sm:$0xff]  ;;  %v41_v3 = vld [vmem:[%s3324_s0] sm:$0xff] }
  0x19   :  { %1912 = vset.pattern.permute.xlu1 %v2089_v0  ;;  %1910 = vset.pattern.permute.xlu0 %v2089_v0  ;;  %v2091_v4 = vmov 1   ;;  %v1112_v5 = vld [vmem:[%s3327_s3 + $0x78] sm:$0xff]  ;;  %v43_v7 = vld [vmem:[%s3324_s0 + $0x10] sm:$0xff]  ;;  %v1110_v10 = vld [vmem:[%s3327_s3 + $0x68] sm:$0xff] }
  0x1a   :  { %1161 = vmatprep.subr.mxu0 %v2090_v1  ;;  %1386 = vmatprep.subr.mxu1 %v2090_v1  ;;  %v1144_v6 = vld [vmem:[%s3327_s3 + $0x178] sm:$0xff]  ;;  %v1111_v8 = vld [vmem:[%s3327_s3 + $0x70] sm:$0xff]  ;;  %v1142_v11 = vld [vmem:[%s3327_s3 + $0x168] sm:$0xff] }
  0x1b   :  { %82 = vperm.xlu1 %1912, %v42_v2   ;;  %77 = vperm.xlu0 %1910, %v41_v3   ;;  %v1143_v9 = vld [vmem:[%s3327_s3 + $0x170] sm:$0xff]  ;;  %v44_v12 = vld [vmem:[%s3324_s0 + $0x18] sm:$0xff]  ;;  %v1109_v13 = vld [vmem:[%s3327_s3 + $0x60] sm:$0xff] }
  0x1c   :  { %1162 = vmatpush1.msra.mxu0 %v1112_v5  ;;  %1387 = vmatpush1.msra.mxu1 %v1144_v6  ;;  %v1141_v14 = vld [vmem:[%s3327_s3 + $0x160] sm:$0xff]  ;;  %v1108_v15 = vld [vmem:[%s3327_s3 + $0x58] sm:$0xff]  ;;  %v1107_v18 = vld [vmem:[%s3327_s3 + $0x50] sm:$0xff] }
  0x1d   :  { %1163 = vmatprep.subr.mxu0 %v2090_v1  ;;  %1388 = vmatprep.subr.mxu1 %v2090_v1  ;;  %v45_v16 = vld [vmem:[%s3324_s0 + $0x20] sm:$0xff]  ;;  %v1140_v17 = vld [vmem:[%s3327_s3 + $0x158] sm:$0xff]  ;;  %v1139_v19 = vld [vmem:[%s3327_s3 + $0x150] sm:$0xff] }
  0x1e   :  { %1164 = vmatpush1.msra.mxu0 %v1111_v8  ;;  %1389 = vmatpush1.msra.mxu1 %v1143_v9  ;;  %v46_v20 = vld [vmem:[%s3324_s0 + $0x28] sm:$0xff]  ;;  %v1105_v23 = vld [vmem:[%s3327_s3 + $0x40] sm:$0xff]  ;;  %v47_v24 = vld [vmem:[%s3324_s0 + $0x30] sm:$0xff] }
  0x1f   :  { %1913 = vset.pattern.permute.xlu1 %v2091_v4  ;;  %1911 = vset.pattern.permute.xlu0 %v2091_v4  ;;  %v1106_v21 = vld [vmem:[%s3327_s3 + $0x48] sm:$0xff]  ;;  %v1137_v25 = vld [vmem:[%s3327_s3 + $0x140] sm:$0xff]  ;;  %v1104_v26 = vld [vmem:[%s3327_s3 + $0x38] sm:$0xff] }
  0x20   :  { %554 = vperm.xlu1 %1913, %v42_v2   ;;  %550 = vperm.xlu0 %1911, %v41_v3   ;;  %v1138_v22 = vld [vmem:[%s3327_s3 + $0x148] sm:$0xff]  ;;  %v1136_v27 = vld [vmem:[%s3327_s3 + $0x138] sm:$0xff]  ;;  %v1103_v29 = vld [vmem:[%s3327_s3 + $0x30] sm:$0xff] }
  0x21   :  { %1165 = vmatprep.subr.mxu0 %v2090_v1  ;;  %1390 = vmatprep.subr.mxu1 %v2090_v1  ;;  %v48_v28 = vld [vmem:[%s3324_s0 + $0x38] sm:$0xff]  ;;  %v1135_v30 = vld [vmem:[%s3327_s3 + $0x130] sm:$0xff]  ;;  %v1102_v31 = vld [vmem:[%s3327_s3 + $0x28] sm:$0xff] }
  0x22   :  { %1166 = vmatpush1.msra.mxu0 %v1110_v10  ;;  %1391 = vmatpush1.msra.mxu1 %v1142_v11  ;;  %v49_v32 = vld [vmem:[%s3324_s0 + $0x40] sm:$0xff]  ;;  %v1134_v33 = vld [vmem:[%s3327_s3 + $0x128] sm:$0xff]  ;;  %v1100_v37 = vld [vmem:[%s3327_s3 + $0x18] sm:$0xff] }
  0x23   :  { %1167 = vmatprep.subr.mxu0 %v2090_v1  ;;  %1392 = vmatprep.subr.mxu1 %v2090_v1  ;;  %v1101_v34 = vld [vmem:[%s3327_s3 + $0x20] sm:$0xff]  ;;  %v50_v36 = vld [vmem:[%s3324_s0 + $0x48] sm:$0xff]  ;;  %v1132_v38 = vld [vmem:[%s3327_s3 + $0x118] sm:$0xff] }
  0x24   :  { %1914 = vset.pattern.permute.xlu1 %v2089_v0  ;;  %558 = vperm.xlu0 %1911, %v43_v7   ;;  %v1133_v35 = vld [vmem:[%s3327_s3 + $0x120] sm:$0xff]  ;;  %v1099_v39 = vld [vmem:[%s3327_s3 + $0x10] sm:$0xff]  ;;  %v1098_v42 = vld [vmem:[%s3327_s3 + $0x8] sm:$0xff] }
  0x25   :  { %87 = vperm.xlu1 %1914, %v43_v7   ;;  %1168 = vmatpush1.msra.mxu0 %v1109_v13  ;;  %v51_v40 = vld [vmem:[%s3324_s0 + $0x50] sm:$0xff]  ;;  %v1130_v43 = vld [vmem:[%s3327_s3 + $0x108] sm:$0xff]  ;;  %v52_v44 = vld [vmem:[%s3324_s0 + $0x58] sm:$0xff] }
  0x26   :  { %1393 = vmatpush1.msra.mxu1 %v1141_v14  ;;  %1169 = vmatprep.subr.mxu0 %v2090_v1  ;;  %v1131_v41 = vld [vmem:[%s3327_s3 + $0x110] sm:$0xff]  ;;  %v1097_v45 = vld [vmem:[%s3327_s3] sm:$0xff]  ;;  %v1128_v47 = vld [vmem:[%s3327_s3 + $0xf8] sm:$0xff] }
  0x27   :  { %1394 = vmatprep.subr.mxu1 %v2090_v1  ;;  %1170 = vmatpush1.msra.mxu0 %v1108_v15  ;;  %v1129_v46 = vld [vmem:[%s3327_s3 + $0x100] sm:$0xff]  ;;  %v1160_v49 = vld [vmem:[%s3327_s3 + $0x1f8] sm:$0xff]  ;;  %v1127_v50 = vld [vmem:[%s3327_s3 + $0xf0] sm:$0xff] }
  0x28   :  { %562 = vperm.xlu0 %1911, %v44_v12   ;;  %1395 = vmatpush1.msra.mxu1 %v1140_v17  ;;  %v53_v48 = vld [vmem:[%s3324_s0 + $0x60] sm:$0xff]  ;;  %v1159_v51 = vld [vmem:[%s3327_s3 + $0x1f0] sm:$0xff]  ;;  %v54_v52 = vld [vmem:[%s3324_s0 + $0x68] sm:$0xff] }
  0x29   :  { %92 = vperm.xlu1 %1914, %v44_v12   ;;  %1171 = vmatprep.subr.mxu0 %v2090_v1  ;;  %v1126_v53 = vld [vmem:[%s3327_s3 + $0xe8] sm:$0xff]  ;;  %v1125_v55 = vld [vmem:[%s3327_s3 + $0xe0] sm:$0xff]  ;;  %v55_v56 = vld [vmem:[%s3324_s0 + $0x70] sm:$0xff] }
  0x2a   :  { %1396 = vmatprep.subr.mxu1 %v2090_v1  ;;  %1172 = vmatpush1.msra.mxu0 %v1107_v18  ;;  %v1158_v54 = vld [vmem:[%s3327_s3 + $0x1e8] sm:$0xff]  ;;  %v1157_v57 = vld [vmem:[%s3327_s3 + $0x1e0] sm:$0xff]  ;;  %v1124_v58 = vld [vmem:[%s3327_s3 + $0xd8] sm:$0xff] }
  0x2b   :  { %1397 = vmatpush1.msra.mxu1 %v1139_v19  ;;  %1173 = vmatprep.subr.mxu0 %v2090_v1  ;;  %v1156_v59 = vld [vmem:[%s3327_s3 + $0x1d8] sm:$0xff]  ;;  %v1123_v61 = vld [vmem:[%s3327_s3 + $0xd0] sm:$0xff]  ;;  %v1122_v63 = vld [vmem:[%s3327_s3 + $0xc8] sm:$0xff] }
  0x2c   :  { %566 = vperm.xlu0 %1911, %v45_v16   ;;  %1398 = vmatprep.subr.mxu1 %v2090_v1  ;;  %v56_v60 = vld [vmem:[%s3324_s0 + $0x78] sm:$0xff]  ;;  %v1155_v62 = vld [vmem:[%s3327_s3 + $0x1d0] sm:$0xff]  ;;  %v57_v0 = vld [vmem:[%s3324_s0 + $0x80] sm:$0xff] }
  0x2d   :  { %97 = vperm.xlu1 %1914, %v45_v16   ;;  %1174 = vmatpush1.msra.mxu0 %v1106_v21  ;;  %v1154_v2 = vld [vmem:[%s3327_s3 + $0x1c8] sm:$0xff]  ;;  %v1121_v3 = vld [vmem:[%s3327_s3 + $0xc0] sm:$0xff]  ;;  %v1120_v6 = vld [vmem:[%s3327_s3 + $0xb8] sm:$0xff] }
  0x2e   :  { %1399 = vmatpush1.msra.mxu1 %v1138_v22  ;;  %1175 = vmatprep.subr.mxu0 %v2090_v1  ;;  %v1153_v4 = vld [vmem:[%s3327_s3 + $0x1c0] sm:$0xff]  ;;  %v58_v5 = vld [vmem:[%s3324_s0 + $0x88] sm:$0xff]  ;;  %v1152_v7 = vld [vmem:[%s3327_s3 + $0x1b8] sm:$0xff] }
  0x2f   :  { %1400 = vmatprep.subr.mxu1 %v2090_v1  ;;  %1176 = vmatpush1.msra.mxu0 %v1105_v23  ;;  %v1119_v8 = vld [vmem:[%s3327_s3 + $0xb0] sm:$0xff]  ;;  %v1118_v11 = vld [vmem:[%s3327_s3 + $0xa8] sm:$0xff]  ;;  %v60_v13 = vld [vmem:[%s3324_s0 + $0x98] sm:$0xff] }
  0x30   :  { %570 = vperm.xlu0 %1911, %v46_v20   ;;  %1401 = vmatpush1.msra.mxu1 %v1137_v25  ;;  %v59_v9 = vld [vmem:[%s3324_s0 + $0x90] sm:$0xff]  ;;  %v1150_v12 = vld [vmem:[%s3327_s3 + $0x1a8] sm:$0xff]  ;;  %v1117_v14 = vld [vmem:[%s3327_s3 + $0xa0] sm:$0xff] }
  0x31   :  { %102 = vperm.xlu1 %1914, %v46_v20   ;;  %1177 = vmatprep.subr.mxu0 %v2090_v1  ;;  %v1151_v10 = vld [vmem:[%s3327_s3 + $0x1b0] sm:$0xff]  ;;  %v1149_v15 = vld [vmem:[%s3327_s3 + $0x1a0] sm:$0xff]  ;;  %v1116_v16 = vld [vmem:[%s3327_s3 + $0x98] sm:$0xff] }
  0x32   :  { %1402 = vmatprep.subr.mxu1 %v2090_v1  ;;  %1178 = vmatpush1.msra.mxu0 %v1104_v26  ;;  %v61_v17 = vld [vmem:[%s3324_s0 + $0xa0] sm:$0xff]  ;;  %v1148_v18 = vld [vmem:[%s3327_s3 + $0x198] sm:$0xff]  ;;  %v1115_v19 = vld [vmem:[%s3327_s3 + $0x90] sm:$0xff] }
  0x33   :  { %1403 = vmatpush1.msra.mxu1 %v1136_v27  ;;  %1179 = vmatprep.subr.mxu0 %v2090_v1  ;;  %v1147_v20 = vld [vmem:[%s3327_s3 + $0x190] sm:$0xff]  ;;  %v62_v21 = vld [vmem:[%s3324_s0 + $0xa8] sm:$0xff]  ;;  %v1145_v26 = vld [vmem:[%s3327_s3 + $0x180] sm:$0xff] }
  0x34   :  { %574 = vperm.xlu0 %1911, %v47_v24   ;;  %1404 = vmatprep.subr.mxu1 %v2090_v1  ;;  %v1114_v22 = vld [vmem:[%s3327_s3 + $0x88] sm:$0xff]  ;;  %v63_v25 = vld [vmem:[%s3324_s0 + $0xb0] sm:$0xff]  ;;  %v64_v27 = vld [vmem:[%s3324_s0 + $0xb8] sm:$0xff] }
  0x35   :  { %107 = vperm.xlu1 %1914, %v47_v24   ;;  %1180 = vmatpush1.msra.mxu0 %v1103_v29  ;;  %v1146_v23 = vld [vmem:[%s3327_s3 + $0x188] sm:$0xff]  ;;  %v1113_v24 = vld [vmem:[%s3327_s3 + $0x80] sm:$0xff]  ;;  %v67_v29 = vld [vmem:[%s3324_s0 + $0xd0] sm:$0xff] }
  0x36   :  { %1405 = vmatpush1.msra.mxu1 %v1135_v30  ;;  %1181 = vmatprep.subr.mxu0 %v2090_v1  ;;  %v236_v30 = vlaneseq }
  0x37   :  { %1406 = vmatprep.subr.mxu1 %v2090_v1  ;;  %1182 = vmatpush1.msra.mxu0 %v1102_v31  ;;  %v68_v31 = vld [vmem:[%s3324_s0 + $0xd8] sm:$0xff] }
  0x38   :  { %578 = vperm.xlu0 %1911, %v48_v28   ;;  %1407 = vmatpush1.msra.mxu1 %v1134_v33  ;;  %v69_v33 = vld [vmem:[%s3324_s0 + $0xe0] sm:$0xff] }
  0x39   :  { %112 = vperm.xlu1 %1914, %v48_v28   ;;  %1183 = vmatprep.subr.mxu0 %v2090_v1  ;;  %v65_v28 = vld [vmem:[%s3324_s0 + $0xc0] sm:$0xff] }
  0x3a   :  { %1408 = vmatprep.subr.mxu1 %v2090_v1  ;;  %1184 = vmatpush1.msra.mxu0 %v1101_v34 }
  0x3b   :  { %1409 = vmatpush1.msra.mxu1 %v1133_v35  ;;  %1185 = vmatprep.subr.mxu0 %v2090_v1 }
  0x3c   :  { %582 = vperm.xlu0 %1911, %v49_v32   ;;  %1410 = vmatprep.subr.mxu1 %v2090_v1 }
  0x3d   :  { %117 = vperm.xlu1 %1914, %v49_v32   ;;  %1186 = vmatpush1.msra.mxu0 %v1100_v37  ;;  %v237_v32 = vshrl.u32 %v236_v30, 7 }
  0x3e   :  { %1411 = vmatpush1.msra.mxu1 %v1132_v38  ;;  %1187 = vmatprep.subr.mxu0 %v2090_v1 }
  0x3f   :  { %1412 = vmatprep.subr.mxu1 %v2090_v1  ;;  %1188 = vmatpush1.msra.mxu0 %v1099_v39  ;;  %v238_v34 = vsub.s32 0, %v237_v32  ;;  %v246_v35 = vsub.s32 4, %v237_v32  ;;  %v242_v37 = vsub.s32 2, %v237_v32  ;;  %v250_v38 = vsub.s32 6, %v237_v32  ;;  %v70_v39 = vld [vmem:[%s3324_s0 + $0xe8] sm:$0xff] }
  0x40   :  { %586 = vperm.xlu0 %1911, %v50_v36   ;;  %1413 = vmatpush1.msra.mxu1 %v1131_v41  ;;  %v415_v41 = vsub.s32 3, %v237_v32 }
  0x41   :  { %122 = vperm.xlu1 %1914, %v50_v36   ;;  %1189 = vmatprep.subr.mxu0 %v2090_v1  ;;  %v73_v36 = vld [vmem:[#allocation2] sm:$0xff] }
  0x42   :  { %1414 = vmatprep.subr.mxu1 %v2090_v1  ;;  %1190 = vmatpush1.msra.mxu0 %v1098_v42  ;;  %v239_v42 = vrot.slane %v73_v36, %v238_v34 }
  0x43   :  { %1415 = vmatpush1.msra.mxu1 %v1130_v43  ;;  %1191 = vmatprep.subr.mxu0 %v2090_v1  ;;  %v247_v43 = vrot.slane %v73_v36, %v246_v35 }
  0x44   :  { %590 = vperm.xlu0 %1911, %v51_v40   ;;  %1416 = vmatprep.subr.mxu1 %v2090_v1 }
  0x45   :  { %127 = vperm.xlu1 %1914, %v51_v40   ;;  %1192 = vmatpush1.msra.mxu0 %v1097_v45  ;;  %v407_v40 = vsub.s32 1, %v237_v32  ;;  %v251_v45 = vrot.slane %v73_v36, %v250_v38 }
  0x46   :  { %1417 = vmatpush1.msra.mxu1 %v1129_v46  ;;  %1193 = vmatprep.subr.mxu0 %v2090_v1  ;;  %v687_v46 = vsub.s32 5, %v237_v32 }
  0x47   :  { %1418 = vmatprep.subr.mxu1 %v2090_v1  ;;  %1194 = vmatpush2.msra.mxu0 %v1128_v47  ;;  %v691_v47 = vsub.s32 7, %v237_v32 }
  0x48   :  { %594 = vperm.xlu0 %1911, %v52_v44   ;;  %1419 = vmatpush2.msra.mxu1 %v1160_v49  ;;  %v680_v49 = vrot.slane %v73_v36, %v407_v40 }
  0x49   :  { %132 = vperm.xlu1 %1914, %v52_v44   ;;  %1195 = vmatprep.subr.mxu0 %v2090_v1  ;;  %v243_v44 = vrot.slane %v73_v36, %v242_v37 }
  0x4a   :  { %1420 = vmatprep.subr.mxu1 %v2090_v1  ;;  %1196 = vmatpush2.msra.mxu0 %v1127_v50  ;;  %v684_v50 = vrot.slane %v73_v36, %v415_v41 }
  0x4b   :  { %1421 = vmatpush2.msra.mxu1 %v1159_v51  ;;  %1197 = vmatprep.subr.mxu0 %v2090_v1  ;;  %v2472_v51 = vrot.slane %v239_v42, %v238_v34 }
  0x4c   :  { %598 = vperm.xlu0 %1911, %v53_v48   ;;  %1422 = vmatprep.subr.mxu1 %v2090_v1 }
  0x4d   :  { %137 = vperm.xlu1 %1914, %v53_v48   ;;  %1198 = vmatpush2.msra.mxu0 %v1126_v53  ;;  %v71_v48 = vld [vmem:[%s3324_s0 + $0xf0] sm:$0xff]  ;;  %v74_v53 = vld [vmem:[#allocation4] sm:$0xf] }
  0x4e   :  { %1423 = vmatpush2.msra.mxu1 %v1158_v54  ;;  %1199 = vmatprep.subr.mxu0 %v2090_v1  ;;  %v2476_v54 = vrot.slane %v243_v44, %v238_v34 }
  0x4f   :  { %1424 = vmatprep.subr.mxu1 %v2090_v1  ;;  %1200 = vmatpush2.msra.mxu0 %v1125_v55  ;;  %v2478_v55 = vrot.slane %v251_v45, %v238_v34 }
  0x50   :  { %602 = vperm.xlu0 %1911, %v54_v52   ;;  %1425 = vmatpush2.msra.mxu1 %v1157_v57  ;;  %v692_v57 = vrot.slane %v73_v36, %v691_v47 }
  0x51   :  { %142 = vperm.xlu1 %1914, %v54_v52   ;;  %1201 = vmatprep.subr.mxu0 %v2090_v1  ;;  %v2474_v52 = vrot.slane %v247_v43, %v238_v34 }
  0x52   :  { %1426 = vmatprep.subr.mxu1 %v2090_v1  ;;  %1202 = vmatpush2.msra.mxu0 %v1124_v58  ;;  %v72_v58 = vld [vmem:[%s3324_s0 + $0xf8] sm:$0xff] }
  0x53   :  { %1427 = vmatpush2.msra.mxu1 %v1156_v59  ;;  %1203 = vmatprep.subr.mxu0 %v2090_v1 }
  0x54   :  { %606 = vperm.xlu0 %1911, %v55_v56   ;;  %1428 = vmatprep.subr.mxu1 %v2090_v1 }
  0x55   :  { %147 = vperm.xlu1 %1914, %v55_v56   ;;  %1204 = vmatpush2.msra.mxu0 %v1123_v61  ;;  %v688_v56 = vrot.slane %v73_v36, %v687_v46  ;;  %v2483_v61 = vrot.slane %v680_v49, %v407_v40 }
  0x56   :  { %1429 = vmatpush2.msra.mxu1 %v1155_v62  ;;  %1205 = vmatprep.subr.mxu0 %v2090_v1  ;;  %v2485_v62 = vrot.slane %v684_v50, %v407_v40 }
  0x57   :  { %1430 = vmatprep.subr.mxu1 %v2090_v1  ;;  %1206 = vmatpush2.msra.mxu0 %v1122_v63  ;;  %v2487_v63 = vrot.slane %v74_v53, %v407_v40 }
  0x58   :  { %610 = vperm.xlu0 %1911, %v56_v60   ;;  %1431 = vmatpush2.msra.mxu1 %v1154_v2 }
  0x59   :  { %152 = vperm.xlu1 %1914, %v56_v60   ;;  %1207 = vmatprep.subr.mxu0 %v2090_v1 }
  0x5a   :  { %1432 = vmatprep.subr.mxu1 %v2090_v1  ;;  %1208 = vmatpush2.msra.mxu0 %v1121_v3 }
  0x5b   :  { %1433 = vmatpush2.msra.mxu1 %v1153_v4  ;;  %1209 = vmatprep.subr.mxu0 %v2090_v1  ;;  %v2493_v4 = vrot.slane %v74_v53, %v238_v34 }
  0x5c   :  { %614 = vperm.xlu0 %1911, %v57_v0   ;;  %1434 = vmatprep.subr.mxu1 %v2090_v1 }
  0x5d   :  { %157 = vperm.xlu1 %1914, %v57_v0   ;;  %1210 = vmatpush2.msra.mxu0 %v1120_v6  ;;  %v2489_v0 = vrot.slane %v74_v53, %v415_v41  ;;  %v2497_v6 = vrot.slane %v688_v56, %v407_v40 }
  0x5e   :  { %1435 = vmatpush2.msra.mxu1 %v1152_v7  ;;  %1211 = vmatprep.subr.mxu0 %v2090_v1  ;;  %v2499_v7 = vrot.slane %v692_v57, %v407_v40 }
  0x5f   :  { %1436 = vmatprep.subr.mxu1 %v2090_v1  ;;  %1212 = vmatpush2.msra.mxu0 %v1119_v8 }
  0x60   :  { %618 = vperm.xlu0 %1911, %v58_v5   ;;  %1437 = vmatpush2.msra.mxu1 %v1151_v10 }
  0x61   :  { %162 = vperm.xlu1 %1914, %v58_v5   ;;  %1213 = vmatprep.subr.mxu0 %v2090_v1  ;;  %v2495_v5 = vrot.slane %v74_v53, %v242_v37 }
  0x62   :  { %1438 = vmatprep.subr.mxu1 %v2090_v1  ;;  %1214 = vmatpush2.msra.mxu0 %v1118_v11 }
  0x63   :  { %1439 = vmatpush2.msra.mxu1 %v1150_v12  ;;  %1215 = vmatprep.subr.mxu0 %v2090_v1 }
  0x64   :  { %622 = vperm.xlu0 %1911, %v59_v9   ;;  %1440 = vmatprep.subr.mxu1 %v2090_v1 }
  0x65   :  { %167 = vperm.xlu1 %1914, %v59_v9   ;;  %1216 = vmatpush2.msra.mxu0 %v1117_v14 }
  0x66   :  { %1441 = vmatpush2.msra.mxu1 %v1149_v15  ;;  %1217 = vmatprep.subr.mxu0 %v2090_v1 }
  0x67   :  { %1442 = vmatprep.subr.mxu1 %v2090_v1  ;;  %1218 = vmatpush2.msra.mxu0 %v1116_v16 }
  0x68   :  { %626 = vperm.xlu0 %1911, %v60_v13   ;;  %1443 = vmatpush2.msra.mxu1 %v1148_v18 }
  0x69   :  { %172 = vperm.xlu1 %1914, %v60_v13   ;;  %1219 = vmatprep.subr.mxu0 %v2090_v1 }
  0x6a   :  { %1444 = vmatprep.subr.mxu1 %v2090_v1  ;;  %1220 = vmatpush2.msra.mxu0 %v1115_v19 }
  0x6b   :  { %1445 = vmatpush2.msra.mxu1 %v1147_v20  ;;  %1221 = vmatprep.subr.mxu0 %v2090_v1 }
  0x6c   :  { %630 = vperm.xlu0 %1911, %v61_v17   ;;  %1446 = vmatprep.subr.mxu1 %v2090_v1 }
  0x6d   :  { %177 = vperm.xlu1 %1914, %v61_v17   ;;  %1222 = vmatpush2.msra.mxu0 %v1114_v22 }
  0x6e   :  { %1447 = vmatpush2.msra.mxu1 %v1146_v23  ;;  %1223 = vmatprep.subr.mxu0 %v2090_v1 }
  0x6f   :  { %1448 = vmatprep.subr.mxu1 %v2090_v1  ;;  %1224 = vmatpush2.msra.mxu0 %v1113_v24  ;;  %v66_v1 = vld [vmem:[%s3324_s0 + $0xc8] sm:$0xff] }
  0x70   :  { %634 = vperm.xlu0 %1911, %v62_v21   ;;  %1449 = vmatpush2.msra.mxu1 %v1145_v26 }
  0x71   :  { %182 = vperm.xlu1 %1914, %v62_v21  }
  0x74   :  { %638 = vperm.xlu0 %1911, %v63_v25  }
  0x75   :  { %187 = vperm.xlu1 %1914, %v63_v25  }
  0x78   :  { %642 = vperm.xlu0 %1911, %v64_v27  }
  0x79   :  { %192 = vperm.xlu1 %1914, %v64_v27  }
  0x7c   :  { %646 = vperm.xlu0 %1911, %v65_v28  }
  0x7d   :  { %197 = vperm.xlu1 %1914, %v65_v28  }
  0x80   :  { %650 = vperm.xlu0 %1911, %v66_v1  }
  0x81   :  { %202 = vperm.xlu1 %1914, %v66_v1  }
  0x84   :  { %654 = vperm.xlu0 %1911, %v67_v29  }
  0x85   :  { %207 = vperm.xlu1 %1914, %v67_v29  }
  0x88   :  { %658 = vperm.xlu0 %1911, %v68_v31  }
  0x89   :  { %212 = vperm.xlu1 %1914, %v68_v31  }
  0x8c   :  { %662 = vperm.xlu0 %1911, %v69_v33  }
  0x8d   :  { %217 = vperm.xlu1 %1914, %v69_v33  }
  0x90   :  { %666 = vperm.xlu0 %1911, %v70_v39  }
  0x91   :  { %222 = vperm.xlu1 %1914, %v70_v39  }
  0x94   :  { %670 = vperm.xlu0 %1911, %v71_v48  }
  0x95   :  { %227 = vperm.xlu1 %1914, %v71_v48  }
  0x96   :  { %v78_v59 = vpop.permute.xlu0 %77  ;;  %v83_v60 = vpop.permute.xlu1 %82 }
  0x97   :  { %v272_v2 = vmul.f32 %v2472_v51, %v78_v59  ;;  %v274_v3 = vmul.f32 %v2474_v52, %v78_v59  ;;  %v273_v8 = vmul.f32 %v2476_v54, %v78_v59  ;;  %v275_v9 = vmul.f32 %v2478_v55, %v78_v59 }
  0x98   :  { %674 = vperm.xlu0 %1911, %v72_v58   ;;  %v276_v10 = vmul.f32 %v2472_v51, %v83_v60  ;;  %v277_v11 = vmul.f32 %v2476_v54, %v83_v60  ;;  %v278_v12 = vmul.f32 %v2474_v52, %v83_v60  ;;  %v279_v13 = vmul.f32 %v2478_v55, %v83_v60 }
  0x99   :  { %232 = vperm.xlu1 %1914, %v72_v58   ;;  %v422_v16 = vadd.f32 %v2487_v63, %v273_v8  ;;  %v424_v17 = vadd.f32 %v2489_v0, %v275_v9  ;;  %v421_v18 = vadd.f32 %v2493_v4, %v272_v2  ;;  %v423_v19 = vadd.f32 %v2495_v5, %v274_v3 }
  0x9a   :  { %v426_v28 = vadd.f32 %v2487_v63, %v277_v11  ;;  %v428_v1 = vadd.f32 %v2489_v0, %v279_v13  ;;  %v425_v29 = vadd.f32 %v2493_v4, %v276_v10  ;;  %v427_v30 = vadd.f32 %v2495_v5, %v278_v12 }
  0x9b   :  { %v555_v14 = vpop.permute.xlu1 %554  ;;  %v551_v15 = vpop.permute.xlu0 %550 }
  0x9c   :  { %v717_v20 = vmul.f32 %v2483_v61, %v555_v14  ;;  %v718_v21 = vmul.f32 %v2485_v62, %v555_v14  ;;  %v719_v22 = vmul.f32 %v2497_v6, %v555_v14  ;;  %v720_v23 = vmul.f32 %v2499_v7, %v555_v14 }
  0x9d   :  { %v713_v24 = vmul.f32 %v2483_v61, %v551_v15  ;;  %v715_v25 = vmul.f32 %v2497_v6, %v551_v15  ;;  %v714_v26 = vmul.f32 %v2485_v62, %v551_v15  ;;  %v716_v27 = vmul.f32 %v2499_v7, %v551_v15 }
  0x9e   :  { %v846_v37 = vadd.f32 %v718_v21, %v426_v28  ;;  %v848_v38 = vadd.f32 %v720_v23, %v428_v1  ;;  %v845_v39 = vadd.f32 %v717_v20, %v425_v29  ;;  %v847_v43 = vadd.f32 %v719_v22, %v427_v30 }
  0x9f   :  { %v559_v31 = vpop.permute.xlu0 %558  ;;  %v842_v32 = vadd.f32 %v714_v26, %v422_v16  ;;  %v844_v33 = vadd.f32 %v716_v27, %v424_v17  ;;  %v841_v34 = vadd.f32 %v713_v24, %v421_v18  ;;  %v843_v35 = vadd.f32 %v715_v25, %v423_v19 }
  0xa0   :  { %v88_v36 = vpop.permute.xlu1 %87  ;;  %v721_v40 = vmul.f32 %v2483_v61, %v559_v31  ;;  %v722_v41 = vmul.f32 %v2485_v62, %v559_v31  ;;  %v723_v48 = vmul.f32 %v2497_v6, %v559_v31  ;;  %v724_v57 = vmul.f32 %v2499_v7, %v559_v31 }
  0xa1   :  { %v281_v42 = vmul.f32 %v2476_v54, %v88_v36  ;;  %v970_v44 = vmax.f32 %v842_v32, 0.0  ;;  %v972_v45 = vmax.f32 %v844_v33, 0.0  ;;  %v969_v46 = vmax.f32 %v841_v34, 0.0 }
  0xa2   :  { %v971_v47 = vmax.f32 %v843_v35, 0.0  ;;  %v280_v49 = vmul.f32 %v2472_v51, %v88_v36  ;;  %v282_v50 = vmul.f32 %v2474_v52, %v88_v36  ;;  %v283_v53 = vmul.f32 %v2478_v55, %v88_v36 }
  0xa3   :  { %v563_v56 = vpop.permute.xlu0 %562  ;;  %1225 = vmatprep.mubr.f32.mxu0 %v970_v44  ;;  %1450 = vmatprep.mubr.f32.mxu1 %v972_v45  ;;  %v974_v60 = vmax.f32 %v846_v37, 0.0  ;;  %v976_v2 = vmax.f32 %v848_v38, 0.0  ;;  %v973_v10 = vmax.f32 %v845_v39, 0.0  ;;  %v975_v13 = vmax.f32 %v847_v43, 0.0 }
  0xa4   :  { %v725_v58 = vmul.f32 %v2483_v61, %v563_v56  ;;  %v93_v59 = vpop.permute.xlu1 %92  ;;  %1226 = vmatmul.mubr.f32.vlgmr.msra.gmra.mxu0 %v969_v46  ;;  %1451 = vmatmul.mubr.f32.vlgmr.msra.gmra.mxu1 %v971_v47  ;;  %v726_v3 = vmul.f32 %v2485_v62, %v563_v56  ;;  %v2534_v8 = vmul.f32 %v2497_v6, %v563_v56 }
  0xa5   :  { %v285_v9 = vmul.f32 %v2476_v54, %v93_v59  ;;  %v284_v11 = vmul.f32 %v2472_v51, %v93_v59  ;;  %v287_v12 = vmul.f32 %v2478_v55, %v93_v59  ;;  %1230 = vmatprep.mubr.f32.mxu0 %v974_v60  ;;  %1455 = vmatprep.mubr.f32.mxu1 %v976_v2 }
  0xa6   :  { %v430_v14 = vadd.f32 %v2487_v63, %v281_v42  ;;  %v432_v16 = vadd.f32 %v2489_v0, %v283_v53  ;;  %v429_v17 = vadd.f32 %v2493_v4, %v280_v49  ;;  %v431_v18 = vadd.f32 %v2495_v5, %v282_v50 }
  0xa7   :  { %v567_v15 = vpop.permute.xlu0 %566  ;;  %v434_v19 = vadd.f32 %v2487_v63, %v285_v9  ;;  %v728_v20 = vmul.f32 %v2499_v7, %v563_v56  ;;  %v286_v21 = vmul.f32 %v2474_v52, %v93_v59  ;;  %v436_v34 = vadd.f32 %v2489_v0, %v287_v12 }
  0xa8   :  { %v2547_v22 = vmul.f32 %v2483_v61, %v567_v15  ;;  %v730_v23 = vmul.f32 %v2485_v62, %v567_v15  ;;  %v98_v24 = vpop.permute.xlu1 %97  ;;  %1231 = vmatmul.mubr.f32.gmra.mxu0 %v973_v10  ;;  %1456 = vmatmul.mubr.f32.gmra.mxu1 %v975_v13  ;;  %v2551_v25 = vmul.f32 %v2497_v6, %v567_v15 }
  0xa9   :  { %v732_v26 = vmul.f32 %v2499_v7, %v567_v15  ;;  %v288_v27 = vmul.f32 %v2472_v51, %v98_v24  ;;  %v289_v28 = vmul.f32 %v2476_v54, %v98_v24  ;;  %v850_v1 = vadd.f32 %v722_v41, %v430_v14 }
  0xaa   :  { %v852_v29 = vadd.f32 %v724_v57, %v432_v16  ;;  %v849_v30 = vadd.f32 %v721_v40, %v429_v17  ;;  %v851_v31 = vadd.f32 %v723_v48, %v431_v18  ;;  %v854_v33 = vadd.f32 %v726_v3, %v434_v19 }
  0xab   :  { %v571_v32 = vpop.permute.xlu0 %570  ;;  %v433_v35 = vadd.f32 %v2493_v4, %v284_v11  ;;  %v290_v36 = vmul.f32 %v2474_v52, %v98_v24  ;;  %v291_v37 = vmul.f32 %v2478_v55, %v98_v24  ;;  %v978_v38 = vmax.f32 %v850_v1, 0.0 }
  0xac   :  { %v980_v39 = vmax.f32 %v852_v29, 0.0  ;;  %v103_v42 = vpop.permute.xlu1 %102  ;;  %v977_v43 = vmax.f32 %v849_v30, 0.0  ;;  %v979_v44 = vmax.f32 %v851_v31, 0.0  ;;  %v2561_v41 = vmul.f32 %v2483_v61, %v571_v32 }
  0xad   :  { %v2564_v40 = vmul.f32 %v2485_v62, %v571_v32  ;;  %1235 = vmatprep.mubr.f32.mxu0 %v978_v38  ;;  %v2567_v45 = vmul.f32 %v2497_v6, %v571_v32  ;;  %v736_v46 = vmul.f32 %v2499_v7, %v571_v32  ;;  %v292_v47 = vmul.f32 %v2472_v51, %v103_v42 }
  0xae   :  { %1460 = vmatprep.mubr.f32.mxu1 %v980_v39  ;;  %v982_v48 = vmax.f32 %v854_v33, 0.0  ;;  %1236 = vmatmul.mubr.f32.gmra.mxu0 %v977_v43  ;;  %v293_v49 = vmul.f32 %v2476_v54, %v103_v42  ;;  %v856_v50 = vadd.f32 %v728_v20, %v436_v34  ;;  %v853_v53 = vadd.f32 %v725_v58, %v433_v35 }
  0xaf   :  { %1461 = vmatmul.mubr.f32.gmra.mxu1 %v979_v44  ;;  %v575_v56 = vpop.permute.xlu0 %574  ;;  %v294_v57 = vmul.f32 %v2474_v52, %v103_v42  ;;  %v295_v59 = vmul.f32 %v2478_v55, %v103_v42  ;;  %v435_v60 = vadd.f32 %v2495_v5, %v286_v21  ;;  %v438_v16 = vadd.f32 %v2487_v63, %v289_v28 }
  0xb0   :  { %1240 = vmatprep.mubr.f32.mxu0 %v982_v48  ;;  %v2576_v2 = vmul.f32 %v2483_v61, %v575_v56  ;;  %v108_v3 = vpop.permute.xlu1 %107  ;;  %v984_v9 = vmax.f32 %v856_v50, 0.0  ;;  %v981_v10 = vmax.f32 %v853_v53, 0.0  ;;  %v2579_v11 = vmul.f32 %v2485_v62, %v575_v56 }
  0xb1   :  { %v2582_v12 = vmul.f32 %v2497_v6, %v575_v56  ;;  %v855_v58 = vadd.f32 %v2534_v8, %v435_v60  ;;  %v2586_v13 = vmul.f32 %v2499_v7, %v575_v56  ;;  %v296_v14 = vmul.f32 %v2472_v51, %v108_v3 }
  0xb2   :  { %v297_v15 = vmul.f32 %v2476_v54, %v108_v3  ;;  %1465 = vmatprep.mubr.f32.mxu1 %v984_v9  ;;  %1241 = vmatmul.mubr.f32.gmra.mxu0 %v981_v10  ;;  %v440_v17 = vadd.f32 %v2489_v0, %v291_v37  ;;  %v437_v18 = vadd.f32 %v2493_v4, %v288_v27 }
  0xb3   :  { %v579_v19 = vpop.permute.xlu0 %578  ;;  %v983_v20 = vmax.f32 %v855_v58, 0.0  ;;  %v298_v21 = vmul.f32 %v2474_v52, %v108_v3  ;;  %v299_v8 = vmul.f32 %v2478_v55, %v108_v3  ;;  %v439_v24 = vadd.f32 %v2495_v5, %v290_v36 }
  0xb4   :  { %v113_v1 = vpop.permute.xlu1 %112  ;;  %v858_v29 = vadd.f32 %v730_v23, %v438_v16  ;;  %v860_v30 = vadd.f32 %v732_v26, %v440_v17  ;;  %v857_v31 = vadd.f32 %v2547_v22, %v437_v18  ;;  %v2598_v32 = vmul.f32 %v2483_v61, %v579_v19 }
  0xb5   :  { %1466 = vmatmul.mubr.f32.gmra.mxu1 %v983_v20  ;;  %v859_v28 = vadd.f32 %v2551_v25, %v439_v24  ;;  %v2602_v27 = vmul.f32 %v2485_v62, %v579_v19  ;;  %v2605_v33 = vmul.f32 %v2497_v6, %v579_v19  ;;  %v2608_v34 = vmul.f32 %v2499_v7, %v579_v19 }
  0xb6   :  { %v986_v35 = vmax.f32 %v858_v29, 0.0  ;;  %v988_v23 = vmax.f32 %v860_v30, 0.0  ;;  %v2611_v26 = vmul.f32 %v2472_v51, %v113_v1  ;;  %v301_v22 = vmul.f32 %v2476_v54, %v113_v1 }
  0xb7   :  { %v583_v36 = vpop.permute.xlu0 %582  ;;  %v985_v37 = vmax.f32 %v857_v31, 0.0  ;;  %v987_v38 = vmax.f32 %v859_v28, 0.0  ;;  %v442_v25 = vadd.f32 %v2487_v63, %v293_v49  ;;  %v444_v39 = vadd.f32 %v2489_v0, %v295_v59 }
  0xb8   :  { %v118_v42 = vpop.permute.xlu1 %117  ;;  %1245 = vmatprep.mubr.f32.mxu0 %v986_v35  ;;  %1470 = vmatprep.mubr.f32.mxu1 %v988_v23  ;;  %v302_v43 = vmul.f32 %v2474_v52, %v113_v1  ;;  %v441_v44 = vadd.f32 %v2493_v4, %v292_v47  ;;  %v443_v48 = vadd.f32 %v2495_v5, %v294_v57 }
  0xb9   :  { %1246 = vmatmul.mubr.f32.gmra.mxu0 %v985_v37  ;;  %1471 = vmatmul.mubr.f32.gmra.mxu1 %v987_v38  ;;  %v303_v50 = vmul.f32 %v2478_v55, %v113_v1  ;;  %v862_v53 = vadd.f32 %v2564_v40, %v442_v25  ;;  %v864_v56 = vadd.f32 %v736_v46, %v444_v39 }
  0xba   :  { %v861_v49 = vadd.f32 %v2561_v41, %v441_v44  ;;  %v863_v59 = vadd.f32 %v2567_v45, %v443_v48  ;;  %v2624_v60 = vmul.f32 %v2483_v61, %v583_v36  ;;  %v2627_v3 = vmul.f32 %v2485_v62, %v583_v36 }
  0xbb   :  { %v587_v47 = vpop.permute.xlu0 %586  ;;  %v990_v9 = vmax.f32 %v862_v53, 0.0  ;;  %v992_v57 = vmax.f32 %v864_v56, 0.0  ;;  %v2630_v10 = vmul.f32 %v2497_v6, %v583_v36  ;;  %v2633_v58 = vmul.f32 %v2499_v7, %v583_v36 }
  0xbc   :  { %v123_v40 = vpop.permute.xlu1 %122  ;;  %v989_v46 = vmax.f32 %v861_v49, 0.0  ;;  %v991_v41 = vmax.f32 %v863_v59, 0.0  ;;  %v304_v45 = vmul.f32 %v2472_v51, %v118_v42  ;;  %v305_v16 = vmul.f32 %v2476_v54, %v118_v42 }
  0xbd   :  { %1250 = vmatprep.mubr.f32.mxu0 %v990_v9  ;;  %1475 = vmatprep.mubr.f32.mxu1 %v992_v57  ;;  %v446_v17 = vadd.f32 %v2487_v63, %v297_v15  ;;  %v448_v18 = vadd.f32 %v2489_v0, %v299_v8  ;;  %v445_v19 = vadd.f32 %v2493_v4, %v296_v14 }
  0xbe   :  { %1251 = vmatmul.mubr.f32.gmra.mxu0 %v989_v46  ;;  %1476 = vmatmul.mubr.f32.gmra.mxu1 %v991_v41  ;;  %v306_v20 = vmul.f32 %v2474_v52, %v118_v42  ;;  %v307_v24 = vmul.f32 %v2478_v55, %v118_v42  ;;  %v447_v1 = vadd.f32 %v2495_v5, %v298_v21 }
  0xbf   :  { %v591_v29 = vpop.permute.xlu0 %590  ;;  %v866_v30 = vadd.f32 %v2579_v11, %v446_v17  ;;  %v868_v31 = vadd.f32 %v2586_v13, %v448_v18  ;;  %v865_v28 = vadd.f32 %v2576_v2, %v445_v19  ;;  %v2647_v15 = vmul.f32 %v2483_v61, %v587_v47 }
  0xc0   :  { %v128_v8 = vpop.permute.xlu1 %127  ;;  %v867_v14 = vadd.f32 %v2582_v12, %v447_v1  ;;  %v2651_v35 = vmul.f32 %v2485_v62, %v587_v47  ;;  %v2654_v23 = vmul.f32 %v2497_v6, %v587_v47  ;;  %v2657_v21 = vmul.f32 %v2499_v7, %v587_v47 }
  0xc1   :  { %v994_v11 = vmax.f32 %v866_v30, 0.0  ;;  %v996_v36 = vmax.f32 %v868_v31, 0.0  ;;  %v2660_v13 = vmul.f32 %v2472_v51, %v123_v40  ;;  %v309_v2 = vmul.f32 %v2476_v54, %v123_v40 }
  0xc2   :  { %v993_v37 = vmax.f32 %v865_v28, 0.0  ;;  %v995_v38 = vmax.f32 %v867_v14, 0.0  ;;  %v450_v12 = vadd.f32 %v2487_v63, %v301_v22  ;;  %v452_v25 = vadd.f32 %v2489_v0, %v303_v50 }
  0xc3   :  { %v595_v39 = vpop.permute.xlu0 %594  ;;  %1255 = vmatprep.mubr.f32.mxu0 %v994_v11  ;;  %1480 = vmatprep.mubr.f32.mxu1 %v996_v36  ;;  %v310_v42 = vmul.f32 %v2474_v52, %v123_v40  ;;  %v449_v44 = vadd.f32 %v2493_v4, %v2611_v26  ;;  %v451_v48 = vadd.f32 %v2495_v5, %v302_v43 }
  0xc4   :  { %v133_v53 = vpop.permute.xlu1 %132  ;;  %1256 = vmatmul.mubr.f32.gmra.mxu0 %v993_v37  ;;  %1481 = vmatmul.mubr.f32.gmra.mxu1 %v995_v38  ;;  %v311_v56 = vmul.f32 %v2478_v55, %v123_v40  ;;  %v870_v49 = vadd.f32 %v2602_v27, %v450_v12  ;;  %v872_v22 = vadd.f32 %v2608_v34, %v452_v25 }
  0xc5   :  { %v869_v50 = vadd.f32 %v2598_v32, %v449_v44  ;;  %v871_v59 = vadd.f32 %v2605_v33, %v451_v48  ;;  %v2675_v47 = vmul.f32 %v2483_v61, %v591_v29  ;;  %v2678_v26 = vmul.f32 %v2485_v62, %v591_v29 }
  0xc6   :  { %v998_v43 = vmax.f32 %v870_v49, 0.0  ;;  %v1000_v9 = vmax.f32 %v872_v22, 0.0  ;;  %v2681_v57 = vmul.f32 %v2497_v6, %v591_v29  ;;  %v2684_v40 = vmul.f32 %v2499_v7, %v591_v29 }
  0xc7   :  { %v599_v27 = vpop.permute.xlu0 %598  ;;  %v997_v34 = vmax.f32 %v869_v50, 0.0  ;;  %v999_v46 = vmax.f32 %v871_v59, 0.0  ;;  %v312_v32 = vmul.f32 %v2472_v51, %v128_v8  ;;  %v313_v33 = vmul.f32 %v2476_v54, %v128_v8 }
  0xc8   :  { %v138_v41 = vpop.permute.xlu1 %137  ;;  %1260 = vmatprep.mubr.f32.mxu0 %v998_v43  ;;  %1485 = vmatprep.mubr.f32.mxu1 %v1000_v9  ;;  %v454_v17 = vadd.f32 %v2487_v63, %v305_v16  ;;  %v456_v18 = vadd.f32 %v2489_v0, %v307_v24  ;;  %v453_v19 = vadd.f32 %v2493_v4, %v304_v45 }
  0xc9   :  { %1261 = vmatmul.mubr.f32.gmra.mxu0 %v997_v34  ;;  %1486 = vmatmul.mubr.f32.gmra.mxu1 %v999_v46  ;;  %v314_v1 = vmul.f32 %v2474_v52, %v128_v8  ;;  %v315_v29 = vmul.f32 %v2478_v55, %v128_v8  ;;  %v455_v30 = vadd.f32 %v2495_v5, %v306_v20 }
  0xca   :  { %v874_v31 = vadd.f32 %v2627_v3, %v454_v17  ;;  %v876_v28 = vadd.f32 %v2633_v58, %v456_v18  ;;  %v873_v14 = vadd.f32 %v2624_v60, %v453_v19  ;;  %v2698_v16 = vmul.f32 %v2483_v61, %v595_v39 }
  0xcb   :  { %v603_v24 = vpop.permute.xlu0 %602  ;;  %v875_v45 = vadd.f32 %v2630_v10, %v455_v30  ;;  %v2702_v11 = vmul.f32 %v2485_v62, %v595_v39  ;;  %v2705_v36 = vmul.f32 %v2497_v6, %v595_v39  ;;  %v2708_v20 = vmul.f32 %v2499_v7, %v595_v39 }
  0xcc   :  { %v2710_v3 = vpop.permute.xlu1 %142  ;;  %v1002_v58 = vmax.f32 %v874_v31, 0.0  ;;  %v1004_v8 = vmax.f32 %v876_v28, 0.0  ;;  %v316_v60 = vmul.f32 %v2472_v51, %v133_v53  ;;  %v317_v37 = vmul.f32 %v2476_v54, %v133_v53 }
  0xcd   :  { %v1001_v38 = vmax.f32 %v873_v14, 0.0  ;;  %v1003_v12 = vmax.f32 %v875_v45, 0.0  ;;  %v458_v10 = vadd.f32 %v2487_v63, %v309_v2  ;;  %v460_v25 = vadd.f32 %v2489_v0, %v311_v56 }
  0xce   :  { %1265 = vmatprep.mubr.f32.mxu0 %v1002_v58  ;;  %1490 = vmatprep.mubr.f32.mxu1 %v1004_v8  ;;  %v318_v44 = vmul.f32 %v2474_v52, %v133_v53  ;;  %v457_v39 = vadd.f32 %v2493_v4, %v2660_v13  ;;  %v459_v48 = vadd.f32 %v2495_v5, %v310_v42 }
  0xcf   :  { %1266 = vmatmul.mubr.f32.gmra.mxu0 %v1001_v38  ;;  %1491 = vmatmul.mubr.f32.gmra.mxu1 %v1003_v12  ;;  %v319_v49 = vmul.f32 %v2478_v55, %v133_v53  ;;  %v878_v22 = vadd.f32 %v2651_v35, %v458_v10  ;;  %v880_v50 = vadd.f32 %v2657_v21, %v460_v25  ;;  %v607_v2 = vpop.permute.xlu0 %606 }
  0xd0   :  { %v877_v56 = vadd.f32 %v2647_v15, %v457_v39  ;;  %v879_v59 = vadd.f32 %v2654_v23, %v459_v48  ;;  %v2726_v43 = vmul.f32 %v2483_v61, %v599_v27  ;;  %v2729_v13 = vmul.f32 %v2485_v62, %v599_v27  ;;  %v2731_v42 = vpop.permute.xlu1 %147 }
  0xd1   :  { %v1006_v9 = vmax.f32 %v878_v22, 0.0  ;;  %v1008_v34 = vmax.f32 %v880_v50, 0.0  ;;  %v2734_v53 = vmul.f32 %v2497_v6, %v599_v27  ;;  %v2737_v35 = vmul.f32 %v2499_v7, %v599_v27 }
  0xd2   :  { %v1005_v21 = vmax.f32 %v877_v56, 0.0  ;;  %v1007_v15 = vmax.f32 %v879_v59, 0.0  ;;  %v320_v23 = vmul.f32 %v2472_v51, %v138_v41  ;;  %v321_v46 = vmul.f32 %v2476_v54, %v138_v41 }
  0xd3   :  { %1270 = vmatprep.mubr.f32.mxu0 %v1006_v9  ;;  %1495 = vmatprep.mubr.f32.mxu1 %v1008_v34  ;;  %v462_v17 = vadd.f32 %v2487_v63, %v313_v33  ;;  %v464_v18 = vadd.f32 %v2489_v0, %v315_v29  ;;  %v461_v19 = vadd.f32 %v2493_v4, %v312_v32  ;;  %v611_v29 = vpop.permute.xlu0 %610 }
  0xd4   :  { %1271 = vmatmul.mubr.f32.gmra.mxu0 %v1005_v21  ;;  %1496 = vmatmul.mubr.f32.gmra.mxu1 %v1007_v15  ;;  %v322_v30 = vmul.f32 %v2474_v52, %v138_v41  ;;  %v323_v27 = vmul.f32 %v2478_v55, %v138_v41  ;;  %v463_v31 = vadd.f32 %v2495_v5, %v314_v1 }
  0xd5   :  { %v882_v28 = vadd.f32 %v2678_v26, %v462_v17  ;;  %v884_v14 = vadd.f32 %v2684_v40, %v464_v18  ;;  %v881_v45 = vadd.f32 %v2675_v47, %v461_v19  ;;  %v2751_v33 = vmul.f32 %v2483_v61, %v603_v24  ;;  %v2763_v26 = vpop.permute.xlu1 %152 }
  0xd6   :  { %v883_v32 = vadd.f32 %v2681_v57, %v463_v31  ;;  %v2755_v58 = vmul.f32 %v2485_v62, %v603_v24  ;;  %v2758_v8 = vmul.f32 %v2497_v6, %v603_v24  ;;  %v2761_v41 = vmul.f32 %v2499_v7, %v603_v24 }
  0xd7   :  { %v1010_v40 = vmax.f32 %v882_v28, 0.0  ;;  %v1012_v1 = vmax.f32 %v884_v14, 0.0  ;;  %v324_v47 = vmul.f32 %v2472_v51, %v2710_v3  ;;  %v325_v38 = vmul.f32 %v2476_v54, %v2710_v3 }
  0xd8   :  { %v1009_v57 = vmax.f32 %v881_v45, 0.0  ;;  %v1011_v12 = vmax.f32 %v883_v32, 0.0  ;;  %v466_v10 = vadd.f32 %v2487_v63, %v317_v37  ;;  %v468_v25 = vadd.f32 %v2489_v0, %v319_v49 }
  0xd9   :  { %1275 = vmatprep.mubr.f32.mxu0 %v1010_v40  ;;  %1500 = vmatprep.mubr.f32.mxu1 %v1012_v1  ;;  %v326_v24 = vmul.f32 %v2474_v52, %v2710_v3  ;;  %v465_v39 = vadd.f32 %v2493_v4, %v316_v60  ;;  %v467_v48 = vadd.f32 %v2495_v5, %v318_v44  ;;  %v615_v44 = vpop.permute.xlu0 %614 }
  0xda   :  { %1276 = vmatmul.mubr.f32.gmra.mxu0 %v1009_v57  ;;  %1501 = vmatmul.mubr.f32.gmra.mxu1 %v1011_v12  ;;  %v327_v22 = vmul.f32 %v2478_v55, %v2710_v3  ;;  %v886_v50 = vadd.f32 %v2702_v11, %v466_v10  ;;  %v888_v37 = vadd.f32 %v2708_v20, %v468_v25  ;;  %v2793_v20 = vpop.permute.xlu1 %157 }
  0xdb   :  { %v885_v49 = vadd.f32 %v2698_v16, %v465_v39  ;;  %v887_v56 = vadd.f32 %v2705_v36, %v467_v48  ;;  %v2782_v59 = vmul.f32 %v2483_v61, %v607_v2  ;;  %v2785_v60 = vmul.f32 %v2485_v62, %v607_v2 }
  0xdc   :  { %v1014_v9 = vmax.f32 %v886_v50, 0.0  ;;  %v1016_v34 = vmax.f32 %v888_v37, 0.0  ;;  %v2788_v21 = vmul.f32 %v2497_v6, %v607_v2  ;;  %v2791_v11 = vmul.f32 %v2499_v7, %v607_v2 }
  0xdd   :  { %v1013_v16 = vmax.f32 %v885_v49, 0.0  ;;  %v1015_v3 = vmax.f32 %v887_v56, 0.0  ;;  %v328_v36 = vmul.f32 %v2472_v51, %v2731_v42  ;;  %v329_v15 = vmul.f32 %v2476_v54, %v2731_v42 }
  0xde   :  { %1280 = vmatprep.mubr.f32.mxu0 %v1014_v9  ;;  %1505 = vmatprep.mubr.f32.mxu1 %v1016_v34  ;;  %v470_v17 = vadd.f32 %v2487_v63, %v321_v46  ;;  %v472_v18 = vadd.f32 %v2489_v0, %v323_v27  ;;  %v469_v19 = vadd.f32 %v2493_v4, %v320_v23  ;;  %v2827_v57 = vpop.permute.xlu1 %162 }
  0xdf   :  { %1281 = vmatmul.mubr.f32.gmra.mxu0 %v1013_v16  ;;  %1506 = vmatmul.mubr.f32.gmra.mxu1 %v1015_v3  ;;  %v330_v2 = vmul.f32 %v2474_v52, %v2731_v42  ;;  %v331_v31 = vmul.f32 %v2478_v55, %v2731_v42  ;;  %v471_v28 = vadd.f32 %v2495_v5, %v322_v30  ;;  %v619_v30 = vpop.permute.xlu0 %618 }
  0xe0   :  { %v890_v14 = vadd.f32 %v2729_v13, %v470_v17  ;;  %v892_v45 = vadd.f32 %v2737_v35, %v472_v18  ;;  %v889_v46 = vadd.f32 %v2726_v43, %v469_v19  ;;  %v2811_v27 = vmul.f32 %v2483_v61, %v611_v29 }
  0xe1   :  { %v891_v23 = vadd.f32 %v2734_v53, %v471_v28  ;;  %v2815_v32 = vmul.f32 %v2485_v62, %v611_v29  ;;  %v2818_v40 = vmul.f32 %v2497_v6, %v611_v29  ;;  %v2821_v42 = vmul.f32 %v2499_v7, %v611_v29 }
  0xe2   :  { %v1018_v13 = vmax.f32 %v890_v14, 0.0  ;;  %v1020_v1 = vmax.f32 %v892_v45, 0.0  ;;  %v332_v43 = vmul.f32 %v2472_v51, %v2763_v26  ;;  %v333_v35 = vmul.f32 %v2476_v54, %v2763_v26  ;;  %v168_v3 = vpop.permute.xlu1 %167 }
  0xe3   :  { %v1017_v53 = vmax.f32 %v889_v46, 0.0  ;;  %v1019_v12 = vmax.f32 %v891_v23, 0.0  ;;  %v474_v10 = vadd.f32 %v2487_v63, %v325_v38  ;;  %v476_v25 = vadd.f32 %v2489_v0, %v327_v22 }
  0xe4   :  { %1285 = vmatprep.mubr.f32.mxu0 %v1018_v13  ;;  %1510 = vmatprep.mubr.f32.mxu1 %v1020_v1  ;;  %v334_v29 = vmul.f32 %v2474_v52, %v2763_v26  ;;  %v473_v39 = vadd.f32 %v2493_v4, %v324_v47  ;;  %v475_v48 = vadd.f32 %v2495_v5, %v326_v24 }
  0xe5   :  { %1286 = vmatmul.mubr.f32.gmra.mxu0 %v1017_v53  ;;  %1511 = vmatmul.mubr.f32.gmra.mxu1 %v1019_v12  ;;  %v335_v50 = vmul.f32 %v2478_v55, %v2763_v26  ;;  %v894_v37 = vadd.f32 %v2755_v58, %v474_v10  ;;  %v896_v38 = vadd.f32 %v2761_v41, %v476_v25  ;;  %v623_v58 = vpop.permute.xlu0 %622 }
  0xe6   :  { %v893_v22 = vadd.f32 %v2751_v33, %v473_v39  ;;  %v895_v49 = vadd.f32 %v2758_v8, %v475_v48  ;;  %v2842_v56 = vmul.f32 %v2483_v61, %v615_v44  ;;  %v2845_v47 = vmul.f32 %v2485_v62, %v615_v44  ;;  %v173_v25 = vpop.permute.xlu1 %172 }
  0xe7   :  { %v1022_v24 = vmax.f32 %v894_v37, 0.0  ;;  %v1024_v9 = vmax.f32 %v896_v38, 0.0  ;;  %v2848_v34 = vmul.f32 %v2497_v6, %v615_v44  ;;  %v2851_v26 = vmul.f32 %v2499_v7, %v615_v44 }
  0xe8   :  { %v1021_v41 = vmax.f32 %v893_v22, 0.0  ;;  %v1023_v16 = vmax.f32 %v895_v49, 0.0  ;;  %v336_v33 = vmul.f32 %v2472_v51, %v2793_v20  ;;  %v337_v8 = vmul.f32 %v2476_v54, %v2793_v20 }
  0xe9   :  { %1290 = vmatprep.mubr.f32.mxu0 %v1022_v24  ;;  %1515 = vmatprep.mubr.f32.mxu1 %v1024_v9  ;;  %v478_v17 = vadd.f32 %v2487_v63, %v329_v15  ;;  %v480_v18 = vadd.f32 %v2489_v0, %v331_v31  ;;  %v477_v19 = vadd.f32 %v2493_v4, %v328_v36  ;;  %v627_v1 = vpop.permute.xlu0 %626 }
  0xea   :  { %1291 = vmatmul.mubr.f32.gmra.mxu0 %v1021_v41  ;;  %1516 = vmatmul.mubr.f32.gmra.mxu1 %v1023_v16  ;;  %v338_v44 = vmul.f32 %v2474_v52, %v2793_v20  ;;  %v339_v28 = vmul.f32 %v2478_v55, %v2793_v20  ;;  %v479_v14 = vadd.f32 %v2495_v5, %v330_v2 }
  0xeb   :  { %v898_v45 = vadd.f32 %v2785_v60, %v478_v17  ;;  %v900_v46 = vadd.f32 %v2791_v11, %v480_v18  ;;  %v897_v15 = vadd.f32 %v2782_v59, %v477_v19  ;;  %v2869_v31 = vmul.f32 %v2483_v61, %v619_v30  ;;  %v178_v19 = vpop.permute.xlu1 %177 }
  0xec   :  { %v899_v36 = vadd.f32 %v2788_v21, %v479_v14  ;;  %v2873_v23 = vmul.f32 %v2485_v62, %v619_v30  ;;  %v2876_v13 = vmul.f32 %v2497_v6, %v619_v30  ;;  %v2879_v20 = vmul.f32 %v2499_v7, %v619_v30 }
  0xed   :  { %v1026_v2 = vmax.f32 %v898_v45, 0.0  ;;  %v1028_v60 = vmax.f32 %v900_v46, 0.0  ;;  %v340_v11 = vmul.f32 %v2472_v51, %v2827_v57  ;;  %v341_v59 = vmul.f32 %v2476_v54, %v2827_v57  ;;  %v631_v41 = vpop.permute.xlu0 %630 }
  0xee   :  { %v1025_v53 = vmax.f32 %v897_v15, 0.0  ;;  %v1027_v21 = vmax.f32 %v899_v36, 0.0  ;;  %v482_v12 = vadd.f32 %v2487_v63, %v333_v35  ;;  %v484_v10 = vadd.f32 %v2489_v0, %v335_v50 }
  0xef   :  { %1295 = vmatprep.mubr.f32.mxu0 %v1026_v2  ;;  %1520 = vmatprep.mubr.f32.mxu1 %v1028_v60  ;;  %v342_v30 = vmul.f32 %v2474_v52, %v2827_v57  ;;  %v481_v39 = vadd.f32 %v2493_v4, %v332_v43  ;;  %v483_v48 = vadd.f32 %v2495_v5, %v334_v29 }
  0xf0   :  { %1296 = vmatmul.mubr.f32.gmra.mxu0 %v1025_v53  ;;  %1521 = vmatmul.mubr.f32.gmra.mxu1 %v1027_v21  ;;  %v343_v37 = vmul.f32 %v2478_v55, %v2827_v57  ;;  %v902_v38 = vadd.f32 %v2815_v32, %v482_v12  ;;  %v904_v35 = vadd.f32 %v2821_v42, %v484_v10 }
  0xf1   :  { %v901_v50 = vadd.f32 %v2811_v27, %v481_v39  ;;  %v903_v22 = vadd.f32 %v2818_v40, %v483_v48  ;;  %v2898_v49 = vmul.f32 %v2483_v61, %v623_v58  ;;  %v2901_v43 = vmul.f32 %v2485_v62, %v623_v58  ;;  %v635_v12 = vpop.permute.xlu0 %634  ;;  %v183_v48 = vpop.permute.xlu1 %182 }
  0xf2   :  { %v1030_v29 = vmax.f32 %v902_v38, 0.0  ;;  %v1032_v24 = vmax.f32 %v904_v35, 0.0  ;;  %v2904_v9 = vmul.f32 %v2497_v6, %v623_v58  ;;  %v2907_v57 = vmul.f32 %v2499_v7, %v623_v58 }
  0xf3   :  { %v1029_v32 = vmax.f32 %v901_v50, 0.0  ;;  %v1031_v42 = vmax.f32 %v903_v22, 0.0  ;;  %v344_v27 = vmul.f32 %v2472_v51, %v168_v3  ;;  %v345_v40 = vmul.f32 %v2476_v54, %v168_v3 }
  0xf4   :  { %1300 = vmatprep.mubr.f32.mxu0 %v1030_v29  ;;  %1525 = vmatprep.mubr.f32.mxu1 %v1032_v24  ;;  %v486_v16 = vadd.f32 %v2487_v63, %v337_v8  ;;  %v488_v17 = vadd.f32 %v2489_v0, %v339_v28  ;;  %v485_v18 = vadd.f32 %v2493_v4, %v336_v33 }
  0xf5   :  { %1301 = vmatmul.mubr.f32.gmra.mxu0 %v1029_v32  ;;  %1526 = vmatmul.mubr.f32.gmra.mxu1 %v1031_v42  ;;  %v346_v58 = vmul.f32 %v2474_v52, %v168_v3  ;;  %v347_v14 = vmul.f32 %v2478_v55, %v168_v3  ;;  %v487_v45 = vadd.f32 %v2495_v5, %v338_v44 }
  0xf6   :  { %v906_v46 = vadd.f32 %v2845_v47, %v486_v16  ;;  %v908_v15 = vadd.f32 %v2851_v26, %v488_v17  ;;  %v905_v36 = vadd.f32 %v2842_v56, %v485_v18  ;;  %v2921_v8 = vmul.f32 %v2483_v61, %v627_v1  ;;  %v639_v17 = vpop.permute.xlu0 %638 }
  0xf7   :  { %v907_v33 = vadd.f32 %v2848_v34, %v487_v45  ;;  %v2925_v28 = vmul.f32 %v2485_v62, %v627_v1  ;;  %v2928_v2 = vmul.f32 %v2497_v6, %v627_v1  ;;  %v2931_v3 = vmul.f32 %v2499_v7, %v627_v1 }
  0xf8   :  { %v1034_v44 = vmax.f32 %v906_v46, 0.0  ;;  %v1036_v47 = vmax.f32 %v908_v15, 0.0  ;;  %v348_v26 = vmul.f32 %v2472_v51, %v173_v25  ;;  %v349_v56 = vmul.f32 %v2476_v54, %v173_v25  ;;  %v188_v46 = vpop.permute.xlu1 %187 }
  0xf9   :  { %v1033_v60 = vmax.f32 %v905_v36, 0.0  ;;  %v1035_v53 = vmax.f32 %v907_v33, 0.0  ;;  %v490_v21 = vadd.f32 %v2487_v63, %v341_v59  ;;  %v492_v34 = vadd.f32 %v2489_v0, %v343_v37 }
  0xfa   :  { %1305 = vmatprep.mubr.f32.mxu0 %v1034_v44  ;;  %1530 = vmatprep.mubr.f32.mxu1 %v1036_v47  ;;  %v350_v10 = vmul.f32 %v2474_v52, %v173_v25  ;;  %v489_v1 = vadd.f32 %v2493_v4, %v340_v11  ;;  %v491_v39 = vadd.f32 %v2495_v5, %v342_v30 }
  0xfb   :  { %1306 = vmatmul.mubr.f32.gmra.mxu0 %v1033_v60  ;;  %1531 = vmatmul.mubr.f32.gmra.mxu1 %v1035_v53  ;;  %v351_v38 = vmul.f32 %v2478_v55, %v173_v25  ;;  %v910_v35 = vadd.f32 %v2873_v23, %v490_v21  ;;  %v912_v59 = vadd.f32 %v2879_v20, %v492_v34 }
  0xfc   :  { %v909_v37 = vadd.f32 %v2869_v31, %v489_v1  ;;  %v911_v50 = vadd.f32 %v2876_v13, %v491_v39  ;;  %v2946_v22 = vmul.f32 %v2483_v61, %v631_v41  ;;  %v2949_v11 = vmul.f32 %v2485_v62, %v631_v41  ;;  %v643_v1 = vpop.permute.xlu0 %642 }
  0xfd   :  { %v1038_v30 = vmax.f32 %v910_v35, 0.0  ;;  %v1040_v29 = vmax.f32 %v912_v59, 0.0  ;;  %v2952_v24 = vmul.f32 %v2497_v6, %v631_v41  ;;  %v2955_v25 = vmul.f32 %v2499_v7, %v631_v41 }
  0xfe   :  { %v1037_v23 = vmax.f32 %v909_v37, 0.0  ;;  %v1039_v20 = vmax.f32 %v911_v50, 0.0  ;;  %v352_v31 = vmul.f32 %v2472_v51, %v178_v19  ;;  %v353_v13 = vmul.f32 %v2476_v54, %v178_v19 }
  0xff   :  { %1310 = vmatprep.mubr.f32.mxu0 %v1038_v30  ;;  %1535 = vmatprep.mubr.f32.mxu1 %v1040_v29  ;;  %v494_v32 = vadd.f32 %v2487_v63, %v345_v40  ;;  %v496_v42 = vadd.f32 %v2489_v0, %v347_v14  ;;  %v493_v16 = vadd.f32 %v2493_v4, %v344_v27 }
 0x100   :  { %1311 = vmatmul.mubr.f32.gmra.mxu0 %v1037_v23  ;;  %1536 = vmatmul.mubr.f32.gmra.mxu1 %v1039_v20  ;;  %v354_v41 = vmul.f32 %v2474_v52, %v178_v19  ;;  %v355_v18 = vmul.f32 %v2478_v55, %v178_v19  ;;  %v495_v45 = vadd.f32 %v2495_v5, %v346_v58 }
 0x101   :  { %v914_v15 = vadd.f32 %v2901_v43, %v494_v32  ;;  %v916_v36 = vadd.f32 %v2907_v57, %v496_v42  ;;  %v913_v40 = vadd.f32 %v2898_v49, %v493_v16  ;;  %v2969_v14 = vmul.f32 %v2483_v61, %v635_v12 }
 0x102   :  { %v915_v27 = vadd.f32 %v2904_v9, %v495_v45  ;;  %v2973_v33 = vmul.f32 %v2485_v62, %v635_v12  ;;  %v2976_v44 = vmul.f32 %v2497_v6, %v635_v12  ;;  %v2979_v19 = vmul.f32 %v2499_v7, %v635_v12  ;;  %v647_v45 = vpop.permute.xlu0 %646 }
 0x103   :  { %v1042_v58 = vmax.f32 %v914_v15, 0.0  ;;  %v1044_v43 = vmax.f32 %v916_v36, 0.0  ;;  %v356_v57 = vmul.f32 %v2472_v51, %v183_v48  ;;  %v357_v49 = vmul.f32 %v2476_v54, %v183_v48 }
 0x104   :  { %v1041_v47 = vmax.f32 %v913_v40, 0.0  ;;  %v1043_v60 = vmax.f32 %v915_v27, 0.0  ;;  %v498_v53 = vadd.f32 %v2487_v63, %v349_v56  ;;  %v500_v9 = vadd.f32 %v2489_v0, %v351_v38  ;;  %v193_v56 = vpop.permute.xlu1 %192 }
 0x105   :  { %1315 = vmatprep.mubr.f32.mxu0 %v1042_v58  ;;  %1540 = vmatprep.mubr.f32.mxu1 %v1044_v43  ;;  %v358_v21 = vmul.f32 %v2474_v52, %v183_v48  ;;  %v497_v34 = vadd.f32 %v2493_v4, %v348_v26  ;;  %v499_v12 = vadd.f32 %v2495_v5, %v350_v10 }
 0x106   :  { %1316 = vmatmul.mubr.f32.gmra.mxu0 %v1041_v47  ;;  %1541 = vmatmul.mubr.f32.gmra.mxu1 %v1043_v60  ;;  %v359_v39 = vmul.f32 %v2478_v55, %v183_v48  ;;  %v918_v35 = vadd.f32 %v2925_v28, %v498_v53  ;;  %v920_v59 = vadd.f32 %v2931_v3, %v500_v9 }
 0x107   :  { %v917_v38 = vadd.f32 %v2921_v8, %v497_v34  ;;  %v919_v37 = vadd.f32 %v2928_v2, %v499_v12  ;;  %v2994_v50 = vmul.f32 %v2483_v61, %v639_v17  ;;  %v2997_v26 = vmul.f32 %v2485_v62, %v639_v17 }
 0x108   :  { %v1046_v10 = vmax.f32 %v918_v35, 0.0  ;;  %v1048_v30 = vmax.f32 %v920_v59, 0.0  ;;  %v3000_v29 = vmul.f32 %v2497_v6, %v639_v17  ;;  %v3003_v28 = vmul.f32 %v2499_v7, %v639_v17  ;;  %v651_v59 = vpop.permute.xlu0 %650 }
 0x109   :  { %v1045_v3 = vmax.f32 %v917_v38, 0.0  ;;  %v1047_v48 = vmax.f32 %v919_v37, 0.0  ;;  %v360_v8 = vmul.f32 %v2472_v51, %v188_v46  ;;  %v361_v2 = vmul.f32 %v2476_v54, %v188_v46 }
 0x10a   :  { %1320 = vmatprep.mubr.f32.mxu0 %v1046_v10  ;;  %1545 = vmatprep.mubr.f32.mxu1 %v1048_v30  ;;  %v502_v23 = vadd.f32 %v2487_v63, %v353_v13  ;;  %v504_v20 = vadd.f32 %v2489_v0, %v355_v18  ;;  %v501_v32 = vadd.f32 %v2493_v4, %v352_v31  ;;  %v198_v18 = vpop.permute.xlu1 %197 }
 0x10b   :  { %1321 = vmatmul.mubr.f32.gmra.mxu0 %v1045_v3  ;;  %1546 = vmatmul.mubr.f32.gmra.mxu1 %v1047_v48  ;;  %v362_v42 = vmul.f32 %v2474_v52, %v188_v46  ;;  %v363_v16 = vmul.f32 %v2478_v55, %v188_v46  ;;  %v503_v17 = vadd.f32 %v2495_v5, %v354_v41 }
 0x10c   :  { %v922_v15 = vadd.f32 %v2949_v11, %v502_v23  ;;  %v924_v36 = vadd.f32 %v2955_v25, %v504_v20  ;;  %v921_v40 = vadd.f32 %v2946_v22, %v501_v32  ;;  %v3017_v13 = vmul.f32 %v2483_v61, %v643_v1 }
 0x10d   :  { %v923_v31 = vadd.f32 %v2952_v24, %v503_v17  ;;  %v3021_v27 = vmul.f32 %v2485_v62, %v643_v1  ;;  %v3024_v46 = vmul.f32 %v2497_v6, %v643_v1  ;;  %v3027_v41 = vmul.f32 %v2499_v7, %v643_v1 }
 0x10e   :  { %v1050_v11 = vmax.f32 %v922_v15, 0.0  ;;  %v1052_v58 = vmax.f32 %v924_v36, 0.0  ;;  %v364_v25 = vmul.f32 %v2472_v51, %v193_v56  ;;  %v365_v22 = vmul.f32 %v2476_v54, %v193_v56 }
 0x10f   :  { %v1049_v43 = vmax.f32 %v921_v40, 0.0  ;;  %v1051_v47 = vmax.f32 %v923_v31, 0.0  ;;  %v506_v60 = vadd.f32 %v2487_v63, %v357_v49  ;;  %v508_v24 = vadd.f32 %v2489_v0, %v359_v39 }
 0x110   :  { %1325 = vmatprep.mubr.f32.mxu0 %v1050_v11  ;;  %1550 = vmatprep.mubr.f32.mxu1 %v1052_v58  ;;  %v366_v53 = vmul.f32 %v2474_v52, %v193_v56  ;;  %v505_v9 = vadd.f32 %v2493_v4, %v356_v57  ;;  %v507_v34 = vadd.f32 %v2495_v5, %v358_v21  ;;  %v203_v21 = vpop.permute.xlu1 %202 }
 0x111   :  { %1326 = vmatmul.mubr.f32.gmra.mxu0 %v1049_v43  ;;  %1551 = vmatmul.mubr.f32.gmra.mxu1 %v1051_v47  ;;  %v367_v12 = vmul.f32 %v2478_v55, %v193_v56  ;;  %v926_v1 = vadd.f32 %v2973_v33, %v506_v60  ;;  %v928_v35 = vadd.f32 %v2979_v19, %v508_v24 }
 0x112   :  { %v925_v49 = vadd.f32 %v2969_v14, %v505_v9  ;;  %v927_v39 = vadd.f32 %v2976_v44, %v507_v34  ;;  %v3042_v38 = vmul.f32 %v2483_v61, %v647_v45  ;;  %v3045_v57 = vmul.f32 %v2485_v62, %v647_v45 }
 0x113   :  { %v1054_v37 = vmax.f32 %v926_v1, 0.0  ;;  %v1056_v10 = vmax.f32 %v928_v35, 0.0  ;;  %v3048_v56 = vmul.f32 %v2497_v6, %v647_v45  ;;  %v3051_v33 = vmul.f32 %v2499_v7, %v647_v45 }
 0x114   :  { %v1053_v19 = vmax.f32 %v925_v49, 0.0  ;;  %v1055_v30 = vmax.f32 %v927_v39, 0.0  ;;  %v368_v14 = vmul.f32 %v2472_v51, %v198_v18  ;;  %v369_v44 = vmul.f32 %v2476_v54, %v198_v18 }
 0x115   :  { %1330 = vmatprep.mubr.f32.mxu0 %v1054_v37  ;;  %1555 = vmatprep.mubr.f32.mxu1 %v1056_v10  ;;  %v510_v3 = vadd.f32 %v2487_v63, %v361_v2  ;;  %v512_v48 = vadd.f32 %v2489_v0, %v363_v16  ;;  %v509_v23 = vadd.f32 %v2493_v4, %v360_v8  ;;  %v655_v16 = vpop.permute.xlu0 %654 }
 0x116   :  { %1331 = vmatmul.mubr.f32.gmra.mxu0 %v1053_v19  ;;  %1556 = vmatmul.mubr.f32.gmra.mxu1 %v1055_v30  ;;  %v370_v20 = vmul.f32 %v2474_v52, %v198_v18  ;;  %v371_v32 = vmul.f32 %v2478_v55, %v198_v18  ;;  %v511_v17 = vadd.f32 %v2495_v5, %v362_v42 }
 0x117   :  { %v930_v45 = vadd.f32 %v2997_v26, %v510_v3  ;;  %v932_v15 = vadd.f32 %v3003_v28, %v512_v48  ;;  %v929_v36 = vadd.f32 %v2994_v50, %v509_v23  ;;  %v3065_v2 = vmul.f32 %v2483_v61, %v651_v59  ;;  %v208_v26 = vpop.permute.xlu1 %207 }
 0x118   :  { %v931_v8 = vadd.f32 %v3000_v29, %v511_v17  ;;  %v3069_v40 = vmul.f32 %v2485_v62, %v651_v59  ;;  %v3072_v31 = vmul.f32 %v2497_v6, %v651_v59  ;;  %v3075_v42 = vmul.f32 %v2499_v7, %v651_v59 }
 0x119   :  { %v1058_v18 = vmax.f32 %v930_v45, 0.0  ;;  %v1060_v28 = vmax.f32 %v932_v15, 0.0  ;;  %v372_v50 = vmul.f32 %v2472_v51, %v203_v21  ;;  %v373_v11 = vmul.f32 %v2476_v54, %v203_v21 }
 0x11a   :  { %v1057_v58 = vmax.f32 %v929_v36, 0.0  ;;  %v1059_v43 = vmax.f32 %v931_v8, 0.0  ;;  %v514_v29 = vadd.f32 %v2487_v63, %v365_v22  ;;  %v516_v47 = vadd.f32 %v2489_v0, %v367_v12 }
 0x11b   :  { %1335 = vmatprep.mubr.f32.mxu0 %v1058_v18  ;;  %1560 = vmatprep.mubr.f32.mxu1 %v1060_v28  ;;  %v374_v60 = vmul.f32 %v2474_v52, %v203_v21  ;;  %v513_v24 = vadd.f32 %v2493_v4, %v364_v25  ;;  %v515_v9 = vadd.f32 %v2495_v5, %v366_v53  ;;  %v659_v25 = vpop.permute.xlu0 %658 }
 0x11c   :  { %1336 = vmatmul.mubr.f32.gmra.mxu0 %v1057_v58  ;;  %1561 = vmatmul.mubr.f32.gmra.mxu1 %v1059_v43  ;;  %v375_v34 = vmul.f32 %v2478_v55, %v203_v21  ;;  %v934_v1 = vadd.f32 %v3021_v27, %v514_v29  ;;  %v936_v35 = vadd.f32 %v3027_v41, %v516_v47  ;;  %v213_v41 = vpop.permute.xlu1 %212 }
 0x11d   :  { %v933_v22 = vadd.f32 %v3017_v13, %v513_v24  ;;  %v935_v12 = vadd.f32 %v3024_v46, %v515_v9  ;;  %v3090_v59 = vmul.f32 %v2483_v61, %v655_v16  ;;  %v3093_v49 = vmul.f32 %v2485_v62, %v655_v16 }
 0x11e   :  { %v1062_v53 = vmax.f32 %v934_v1, 0.0  ;;  %v1064_v39 = vmax.f32 %v936_v35, 0.0  ;;  %v3096_v37 = vmul.f32 %v2497_v6, %v655_v16  ;;  %v3099_v27 = vmul.f32 %v2499_v7, %v655_v16 }
 0x11f   :  { %v1061_v21 = vmax.f32 %v933_v22, 0.0  ;;  %v1063_v13 = vmax.f32 %v935_v12, 0.0  ;;  %v376_v46 = vmul.f32 %v2472_v51, %v208_v26  ;;  %v377_v10 = vmul.f32 %v2476_v54, %v208_v26 }
 0x120   :  { %1340 = vmatprep.mubr.f32.mxu0 %v1062_v53  ;;  %1565 = vmatprep.mubr.f32.mxu1 %v1064_v39  ;;  %v518_v19 = vadd.f32 %v2487_v63, %v369_v44  ;;  %v520_v30 = vadd.f32 %v2489_v0, %v371_v32  ;;  %v517_v3 = vadd.f32 %v2493_v4, %v368_v14  ;;  %v218_v18 = vpop.permute.xlu1 %217 }
 0x121   :  { %1341 = vmatmul.mubr.f32.gmra.mxu0 %v1061_v21  ;;  %1566 = vmatmul.mubr.f32.gmra.mxu1 %v1063_v13  ;;  %v378_v48 = vmul.f32 %v2474_v52, %v208_v26  ;;  %v379_v23 = vmul.f32 %v2478_v55, %v208_v26  ;;  %v519_v17 = vadd.f32 %v2495_v5, %v370_v20  ;;  %v663_v20 = vpop.permute.xlu0 %662 }
 0x122   :  { %v938_v45 = vadd.f32 %v3045_v57, %v518_v19  ;;  %v940_v15 = vadd.f32 %v3051_v33, %v520_v30  ;;  %v937_v36 = vadd.f32 %v3042_v38, %v517_v3  ;;  %v3113_v44 = vmul.f32 %v2483_v61, %v659_v25 }
 0x123   :  { %v939_v32 = vadd.f32 %v3048_v56, %v519_v17  ;;  %v3117_v14 = vmul.f32 %v2485_v62, %v659_v25  ;;  %v3120_v16 = vmul.f32 %v2497_v6, %v659_v25  ;;  %v3123_v8 = vmul.f32 %v2499_v7, %v659_v25 }
 0x124   :  { %v1066_v57 = vmax.f32 %v938_v45, 0.0  ;;  %v1068_v26 = vmax.f32 %v940_v15, 0.0  ;;  %v380_v33 = vmul.f32 %v2472_v51, %v213_v41  ;;  %v381_v38 = vmul.f32 %v2476_v54, %v213_v41 }
 0x125   :  { %v1065_v28 = vmax.f32 %v937_v36, 0.0  ;;  %v1067_v58 = vmax.f32 %v939_v32, 0.0  ;;  %v522_v56 = vadd.f32 %v2487_v63, %v373_v11  ;;  %v524_v43 = vadd.f32 %v2489_v0, %v375_v34 }
 0x126   :  { %1345 = vmatprep.mubr.f32.mxu0 %v1066_v57  ;;  %1570 = vmatprep.mubr.f32.mxu1 %v1068_v26  ;;  %v382_v29 = vmul.f32 %v2474_v52, %v213_v41  ;;  %v521_v47 = vadd.f32 %v2493_v4, %v372_v50  ;;  %v523_v24 = vadd.f32 %v2495_v5, %v374_v60 }
 0x127   :  { %1346 = vmatmul.mubr.f32.gmra.mxu0 %v1065_v28  ;;  %1571 = vmatmul.mubr.f32.gmra.mxu1 %v1067_v58  ;;  %v383_v9 = vmul.f32 %v2478_v55, %v213_v41  ;;  %v942_v1 = vadd.f32 %v3069_v40, %v522_v56  ;;  %v944_v35 = vadd.f32 %v3075_v42, %v524_v43  ;;  %v667_v40 = vpop.permute.xlu0 %666  ;;  %v223_v41 = vpop.permute.xlu1 %222 }
 0x128   :  { %v941_v11 = vadd.f32 %v3065_v2, %v521_v47  ;;  %v943_v34 = vadd.f32 %v3072_v31, %v523_v24  ;;  %v3138_v22 = vmul.f32 %v2483_v61, %v663_v20  ;;  %v3141_v12 = vmul.f32 %v2485_v62, %v663_v20 }
 0x129   :  { %v1070_v50 = vmax.f32 %v942_v1, 0.0  ;;  %v1072_v60 = vmax.f32 %v944_v35, 0.0  ;;  %v3144_v25 = vmul.f32 %v2497_v6, %v663_v20  ;;  %v3147_v53 = vmul.f32 %v2499_v7, %v663_v20 }
 0x12a   :  { %v1069_v42 = vmax.f32 %v941_v11, 0.0  ;;  %v1071_v39 = vmax.f32 %v943_v34, 0.0  ;;  %v384_v2 = vmul.f32 %v2472_v51, %v218_v18  ;;  %v385_v31 = vmul.f32 %v2476_v54, %v218_v18 }
 0x12b   :  { %1350 = vmatprep.mubr.f32.mxu0 %v1070_v50  ;;  %1575 = vmatprep.mubr.f32.mxu1 %v1072_v60  ;;  %v526_v21 = vadd.f32 %v2487_v63, %v377_v10  ;;  %v528_v13 = vadd.f32 %v2489_v0, %v379_v23  ;;  %v525_v19 = vadd.f32 %v2493_v4, %v376_v46  ;;  %v671_v57 = vpop.permute.xlu0 %670  ;;  %v228_v58 = vpop.permute.xlu1 %227 }
 0x12c   :  { %1351 = vmatmul.mubr.f32.gmra.mxu0 %v1069_v42  ;;  %1576 = vmatmul.mubr.f32.gmra.mxu1 %v1071_v39  ;;  %v386_v30 = vmul.f32 %v2474_v52, %v218_v18  ;;  %v387_v3 = vmul.f32 %v2478_v55, %v218_v18  ;;  %v527_v17 = vadd.f32 %v2495_v5, %v378_v48 }
 0x12d   :  { %v946_v45 = vadd.f32 %v3093_v49, %v526_v21  ;;  %v948_v15 = vadd.f32 %v3099_v27, %v528_v13  ;;  %v945_v36 = vadd.f32 %v3090_v59, %v525_v19  ;;  %v3161_v10 = vmul.f32 %v2483_v61, %v667_v40 }
 0x12e   :  { %v947_v23 = vadd.f32 %v3096_v37, %v527_v17  ;;  %v3165_v46 = vmul.f32 %v2485_v62, %v667_v40  ;;  %v3168_v32 = vmul.f32 %v2497_v6, %v667_v40  ;;  %v3171_v20 = vmul.f32 %v2499_v7, %v667_v40 }
 0x12f   :  { %v1074_v48 = vmax.f32 %v946_v45, 0.0  ;;  %v1076_v49 = vmax.f32 %v948_v15, 0.0  ;;  %v3174_v27 = vmul.f32 %v2472_v51, %v223_v41  ;;  %v389_v59 = vmul.f32 %v2476_v54, %v223_v41  ;;  %v675_v39 = vpop.permute.xlu0 %674  ;;  %v233_v21 = vpop.permute.xlu1 %232 }
 0x130   :  { %v1073_v26 = vmax.f32 %v945_v36, 0.0  ;;  %v1075_v18 = vmax.f32 %v947_v23, 0.0  ;;  %v530_v37 = vadd.f32 %v2487_v63, %v381_v38  ;;  %v532_v28 = vadd.f32 %v2489_v0, %v383_v9 }
 0x131   :  { %1355 = vmatprep.mubr.f32.mxu0 %v1074_v48  ;;  %1580 = vmatprep.mubr.f32.mxu1 %v1076_v49  ;;  %v390_v56 = vmul.f32 %v2474_v52, %v223_v41  ;;  %v529_v43 = vadd.f32 %v2493_v4, %v380_v33  ;;  %v531_v47 = vadd.f32 %v2495_v5, %v382_v29 }
 0x132   :  { %1356 = vmatmul.mubr.f32.gmra.mxu0 %v1073_v26  ;;  %1581 = vmatmul.mubr.f32.gmra.mxu1 %v1075_v18  ;;  %v391_v24 = vmul.f32 %v2478_v55, %v223_v41  ;;  %v950_v1 = vadd.f32 %v3117_v14, %v530_v37  ;;  %v952_v35 = vadd.f32 %v3123_v8, %v532_v28 }
 0x133   :  { %v949_v38 = vadd.f32 %v3113_v44, %v529_v43  ;;  %v951_v9 = vadd.f32 %v3120_v16, %v531_v47  ;;  %v833_v11 = vmul.f32 %v2483_v61, %v671_v57  ;;  %v834_v34 = vmul.f32 %v2485_v62, %v671_v57 }
 0x134   :  { %v1078_v50 = vmax.f32 %v950_v1, 0.0  ;;  %v1080_v33 = vmax.f32 %v952_v35, 0.0  ;;  %v835_v29 = vmul.f32 %v2497_v6, %v671_v57  ;;  %v836_v60 = vmul.f32 %v2499_v7, %v671_v57 }
 0x135   :  { %v1077_v40 = vmax.f32 %v949_v38, 0.0  ;;  %v1079_v42 = vmax.f32 %v951_v9, 0.0  ;;  %v392_v14 = vmul.f32 %v2472_v51, %v228_v58  ;;  %v393_v8 = vmul.f32 %v2476_v54, %v228_v58 }
 0x136   :  { %1360 = vmatprep.mubr.f32.mxu0 %v1078_v50  ;;  %1585 = vmatprep.mubr.f32.mxu1 %v1080_v33  ;;  %v534_v44 = vadd.f32 %v2487_v63, %v385_v31  ;;  %v536_v16 = vadd.f32 %v2489_v0, %v387_v3  ;;  %v533_v41 = vadd.f32 %v2493_v4, %v384_v2 }
 0x137   :  { %1361 = vmatmul.mubr.f32.gmra.mxu0 %v1077_v40  ;;  %1586 = vmatmul.mubr.f32.gmra.mxu1 %v1079_v42  ;;  %v394_v13 = vmul.f32 %v2474_v52, %v228_v58  ;;  %v395_v19 = vmul.f32 %v2478_v55, %v228_v58  ;;  %v535_v17 = vadd.f32 %v2495_v5, %v386_v30 }
 0x138   :  { %v954_v45 = vadd.f32 %v3141_v12, %v534_v44  ;;  %v956_v15 = vadd.f32 %v3147_v53, %v536_v16  ;;  %v953_v36 = vadd.f32 %v3138_v22, %v533_v41  ;;  %v838_v31 = vmul.f32 %v2485_v62, %v675_v39 }
 0x139   :  { %v955_v3 = vadd.f32 %v3144_v25, %v535_v17  ;;  %v840_v2 = vmul.f32 %v2499_v7, %v675_v39  ;;  %v396_v23 = vmul.f32 %v2472_v51, %v233_v21  ;;  %v397_v48 = vmul.f32 %v2476_v54, %v233_v21 }
 0x13a   :  { %v1082_v49 = vmax.f32 %v954_v45, 0.0  ;;  %v1084_v57 = vmax.f32 %v956_v15, 0.0  ;;  %v1081_v26 = vmax.f32 %v953_v36, 0.0  ;;  %v398_v30 = vmul.f32 %v2474_v52, %v233_v21 }
 0x13b   :  { %v1083_v12 = vmax.f32 %v955_v3, 0.0  ;;  %v399_v53 = vmul.f32 %v2478_v55, %v233_v21  ;;  %v545_v22 = vadd.f32 %v2493_v4, %v396_v23  ;;  %v546_v62 = vadd.f32 %v2487_v63, %v397_v48 }
 0x13c   :  { %1365 = vmatprep.mubr.f32.mxu0 %v1082_v49  ;;  %1590 = vmatprep.mubr.f32.mxu1 %v1084_v57  ;;  %v547_v7 = vadd.f32 %v2495_v5, %v398_v30  ;;  %v538_v51 = vadd.f32 %v2487_v63, %v389_v59  ;;  %v540_v54 = vadd.f32 %v2489_v0, %v391_v24 }
 0x13d   :  { %1366 = vmatmul.mubr.f32.gmra.mxu0 %v1081_v26  ;;  %1591 = vmatmul.mubr.f32.gmra.mxu1 %v1083_v12  ;;  %v548_v25 = vadd.f32 %v2489_v0, %v399_v53  ;;  %v537_v52 = vadd.f32 %v2493_v4, %v3174_v27  ;;  %v539_v55 = vadd.f32 %v2495_v5, %v390_v56 }
 0x13e   :  { %v958_v18 = vadd.f32 %v3165_v46, %v538_v51  ;;  %v960_v37 = vadd.f32 %v3171_v20, %v540_v54  ;;  %v542_v28 = vadd.f32 %v2487_v63, %v393_v8  ;;  %v544_v58 = vadd.f32 %v2489_v0, %v395_v19 }
 0x13f   :  { %v957_v59 = vadd.f32 %v3161_v10, %v537_v52  ;;  %v959_v43 = vadd.f32 %v3168_v32, %v539_v55  ;;  %v541_v47 = vadd.f32 %v2493_v4, %v392_v14  ;;  %v543_v24 = vadd.f32 %v2495_v5, %v394_v13 }
 0x140   :  { %v1086_v1 = vmax.f32 %v958_v18, 0.0  ;;  %v1088_v27 = vmax.f32 %v960_v37, 0.0  ;;  %v962_v35 = vadd.f32 %v834_v34, %v542_v28  ;;  %v964_v56 = vadd.f32 %v836_v60, %v544_v58 }
 0x141   :  { %v1085_v38 = vmax.f32 %v957_v59, 0.0  ;;  %v1087_v46 = vmax.f32 %v959_v43, 0.0  ;;  %v961_v9 = vadd.f32 %v833_v11, %v541_v47  ;;  %v963_v20 = vadd.f32 %v835_v29, %v543_v24 }
 0x142   :  { %1370 = vmatprep.mubr.f32.mxu0 %v1086_v1  ;;  %1595 = vmatprep.mubr.f32.mxu1 %v1088_v27  ;;  %v1090_v63 = vmax.f32 %v962_v35, 0.0  ;;  %v1092_v0 = vmax.f32 %v964_v56, 0.0  ;;  %v966_v50 = vadd.f32 %v838_v31, %v546_v62  ;;  %v968_v10 = vadd.f32 %v840_v2, %v548_v25 }
 0x143   :  { %v837_v32 = vmul.f32 %v2483_v61, %v675_v39  ;;  %v839_v4 = vmul.f32 %v2497_v6, %v675_v39  ;;  %1371 = vmatmul.mubr.f32.gmra.mxu0 %v1085_v38  ;;  %1596 = vmatmul.mubr.f32.gmra.mxu1 %v1087_v46  ;;  %v1089_v33 = vmax.f32 %v961_v9, 0.0  ;;  %v1091_v60 = vmax.f32 %v963_v20, 0.0 }
 0x144   :  { %1375 = vmatprep.mubr.f32.mxu0 %v1090_v63  ;;  %1600 = vmatprep.mubr.f32.mxu1 %v1092_v0  ;;  %v1094_v5 = vmax.f32 %v966_v50, 0.0  ;;  %v1096_v34 = vmax.f32 %v968_v10, 0.0 }
 0x145   :  { %v965_v11 = vadd.f32 %v837_v32, %v545_v22  ;;  %v967_v29 = vadd.f32 %v839_v4, %v547_v7 }
 0x147   :  { %1376 = vmatmul.mubr.f32.gmra.mxu0 %v1089_v33  ;;  %1601 = vmatmul.mubr.f32.gmra.mxu1 %v1091_v60  ;;  %v1093_v40 = vmax.f32 %v965_v11, 0.0  ;;  %v1095_v42 = vmax.f32 %v967_v29, 0.0 }
 0x148   :  { %1380 = vmatprep.mubr.f32.mxu0 %v1094_v5  ;;  %1605 = vmatprep.mubr.f32.mxu1 %v1096_v34 }
 0x14b   :  { %1381 = vmatmul.mubr.f32.gmra.mxu0 %v1093_v40  ;;  %1606 = vmatmul.mubr.f32.gmra.mxu1 %v1095_v42 }
 0x164   :  { %v1227_v61 = vpop.f32.mrf.mxu0  ;;  %v1452_v6 = vpop.f32.mrf.mxu1 }
 0x165   :  { %v1453_v14 = vadd.f32 %v1452_v6, %v1227_v61 }
 0x166   :  { %v1229_v8 = vpop.f32.mrf.mxu0  ;;  %v1454_v39 = vpop.f32.mrf.mxu1 }
 0x167   :  { %v1873_v44 = vmul.f32 -1.442695, %v1453_v14 }
 0x168   :  { %v1232_v16 = vpop.f32.mrf.mxu0  ;;  %v1457_v41 = vpop.f32.mrf.mxu1 }
 0x169   :  { %1915 = vpow2.f32 %v1873_v44  ;;  %v1458_v21 = vadd.f32 %v1457_v41, %v1232_v16 }
 0x16a   :  { %v1234_v13 = vpop.f32.mrf.mxu0  ;;  %v1459_v19 = vpop.f32.mrf.mxu1 }
 0x16b   :  { %v1874_v17 = vmul.f32 -1.442695, %v1458_v21 }
 0x16d   :  { %1917 = vpow2.f32 %v1874_v17 }
 0x16e   :  { %v1237_v45 = vpop.f32.mrf.mxu0 }
 0x16f   :  { %v1462_v15 = vpop.f32.mrf.mxu1 }
 0x170   :  { %v1463_v36 = vadd.f32 %v1462_v15, %v1237_v45  ;;  %v1239_v31 = vpop.f32.mrf.mxu0 }
 0x171   :  { %v1464_v3 = vpop.f32.mrf.mxu1 }
 0x172   :  { %v1875_v2 = vmul.f32 -1.442695, %v1463_v36  ;;  %v1242_v23 = vpop.f32.mrf.mxu0 }
 0x174   :  { %1919 = vpow2.f32 %v1875_v2  ;;  %v1244_v48 = vpop.f32.mrf.mxu0 }
 0x175   :  { %v1467_v49 = vpop.f32.mrf.mxu1 }
 0x176   :  { %v1916_v57 = vpop.eup %1915  ;;  %v1468_v26 = vadd.f32 %v1467_v49, %v1242_v23 }
 0x177   :  { %v1707_v30 = vadd.f32 1.0, %v1916_v57  ;;  %v1469_v12 = vpop.f32.mrf.mxu1 }
 0x178   :  { %v1876_v53 = vmul.f32 -1.442695, %v1468_v26 }
 0x179   :  { %1921 = vrcp.f32 %v1707_v30  ;;  %v1247_v22 = vpop.f32.mrf.mxu0  ;;  %v1472_v62 = vpop.f32.mrf.mxu1 }
 0x17a   :  { %v1918_v7 = vpop.eup %1917  ;;  %1923 = vpow2.f32 %v1876_v53  ;;  %v1473_v51 = vadd.f32 %v1472_v62, %v1247_v22 }
 0x17b   :  { %v1708_v54 = vadd.f32 1.0, %v1918_v7  ;;  %v1249_v25 = vpop.f32.mrf.mxu0  ;;  %v1474_v52 = vpop.f32.mrf.mxu1 }
 0x17c   :  { %v1877_v55 = vmul.f32 -1.442695, %v1473_v51 }
 0x17d   :  { %1925 = vrcp.f32 %v1708_v54 }
 0x17e   :  { %1927 = vpow2.f32 %v1877_v55  ;;  %v1252_v18 = vpop.f32.mrf.mxu0  ;;  %v1477_v37 = vpop.f32.mrf.mxu1 }
 0x17f   :  { %v1478_v28 = vadd.f32 %v1477_v37, %v1252_v18 }
 0x180   :  { %v1254_v59 = vpop.f32.mrf.mxu0  ;;  %v1479_v43 = vpop.f32.mrf.mxu1 }
 0x181   :  { %v1920_v58 = vpop.eup %1919  ;;  %v1878_v24 = vmul.f32 -1.442695, %v1478_v28 }
 0x182   :  { %v1709_v47 = vadd.f32 1.0, %v1920_v58 }
 0x184   :  { %1929 = vrcp.f32 %v1709_v47  ;;  %v1257_v1 = vpop.f32.mrf.mxu0  ;;  %v1482_v27 = vpop.f32.mrf.mxu1 }
 0x185   :  { %1931 = vpow2.f32 %v1878_v24  ;;  %v1483_v35 = vadd.f32 %v1482_v27, %v1257_v1 }
 0x186   :  { %v1922_v56 = vpop.eup %1921  ;;  %v1259_v38 = vpop.f32.mrf.mxu0 }
 0x187   :  { %v1484_v46 = vpop.f32.mrf.mxu1  ;;  %v1924_v9 = vpop.eup %1923  ;;  %v1803_v20 = vmul.f32 16.0, %v1922_v56  ;;  %v1879_v63 = vmul.f32 -1.442695, %v1483_v35 }
 0x188   :  { %v1710_v0 = vadd.f32 1.0, %v1924_v9 }
 0x189   :  { %1835 = vst [vmem:[%s3328_s4] sm:$0xff] %v1803_v20  ;;  %1933 = vpow2.f32 %v1879_v63  ;;  %v1262_v50 = vpop.f32.mrf.mxu0  ;;  %v1487_v10 = vpop.f32.mrf.mxu1 }
 0x18a   :  { %v1926_v32 = vpop.eup %1925  ;;  %1935 = vrcp.f32 %v1710_v0  ;;  %v1488_v4 = vadd.f32 %v1487_v10, %v1262_v50 }
 0x18b   :  { %v1928_v5 = vpop.eup %1927  ;;  %v1804_v34 = vmul.f32 16.0, %v1926_v32  ;;  %v1264_v33 = vpop.f32.mrf.mxu0 }
 0x18c   :  { %v1489_v60 = vpop.f32.mrf.mxu1  ;;  %v1711_v11 = vadd.f32 1.0, %v1928_v5  ;;  %v1880_v29 = vmul.f32 -1.442695, %v1488_v4 }
 0x18d   :  { %1836 = vst [vmem:[%s3328_s4 + $0x8] sm:$0xff] %v1804_v34 }
 0x18e   :  { %1937 = vrcp.f32 %v1711_v11 }
 0x18f   :  { %1939 = vpow2.f32 %v1880_v29  ;;  %v1267_v40 = vpop.f32.mrf.mxu0  ;;  %v1492_v42 = vpop.f32.mrf.mxu1 }
 0x190   :  { %v1493_v6 = vadd.f32 %v1492_v42, %v1267_v40 }
 0x191   :  { %v1930_v61 = vpop.eup %1929  ;;  %v1269_v39 = vpop.f32.mrf.mxu0 }
 0x192   :  { %v1932_v14 = vpop.eup %1931  ;;  %v1805_v8 = vmul.f32 16.0, %v1930_v61  ;;  %v1494_v44 = vpop.f32.mrf.mxu1  ;;  %v1881_v41 = vmul.f32 -1.442695, %v1493_v6 }
 0x193   :  { %v1712_v16 = vadd.f32 1.0, %v1932_v14 }
 0x194   :  { %1837 = vst [vmem:[%s3328_s4 + $0x10] sm:$0xff] %v1805_v8  ;;  %v1272_v21 = vpop.f32.mrf.mxu0  ;;  %v1497_v13 = vpop.f32.mrf.mxu1 }
 0x195   :  { %1941 = vrcp.f32 %v1712_v16  ;;  %v1498_v19 = vadd.f32 %v1497_v13, %v1272_v21 }
 0x196   :  { %1943 = vpow2.f32 %v1881_v41  ;;  %v1934_v17 = vpop.eup %1933  ;;  %v1274_v45 = vpop.f32.mrf.mxu0 }
 0x197   :  { %v1499_v15 = vpop.f32.mrf.mxu1  ;;  %v1936_v36 = vpop.eup %1935  ;;  %v1713_v31 = vadd.f32 1.0, %v1934_v17  ;;  %v1882_v3 = vmul.f32 -1.442695, %v1498_v19 }
 0x198   :  { %v1806_v2 = vmul.f32 16.0, %v1936_v36 }
 0x199   :  { %1945 = vrcp.f32 %v1713_v31 }
 0x19a   :  { %1838 = vst [vmem:[%s3328_s4 + $0x18] sm:$0xff] %v1806_v2  ;;  %1947 = vpow2.f32 %v1882_v3  ;;  %v1277_v23 = vpop.f32.mrf.mxu0  ;;  %v1502_v48 = vpop.f32.mrf.mxu1 }
 0x19b   :  { %v1938_v49 = vpop.eup %1937  ;;  %v1503_v57 = vadd.f32 %v1502_v48, %v1277_v23 }
 0x19c   :  { %v1940_v26 = vpop.eup %1939  ;;  %v1807_v30 = vmul.f32 16.0, %v1938_v49  ;;  %v1279_v12 = vpop.f32.mrf.mxu0 }
 0x19d   :  { %v1504_v53 = vpop.f32.mrf.mxu1  ;;  %v1714_v22 = vadd.f32 1.0, %v1940_v26  ;;  %v1883_v62 = vmul.f32 -1.442695, %v1503_v57 }
 0x19e   :  { %1839 = vst [vmem:[%s3328_s4 + $0x20] sm:$0xff] %v1807_v30 }
 0x19f   :  { %1949 = vrcp.f32 %v1714_v22  ;;  %v1282_v7 = vpop.f32.mrf.mxu0  ;;  %v1507_v51 = vpop.f32.mrf.mxu1 }
 0x1a0   :  { %1951 = vpow2.f32 %v1883_v62  ;;  %v1508_v54 = vadd.f32 %v1507_v51, %v1282_v7 }
 0x1a1   :  { %v1284_v52 = vpop.f32.mrf.mxu0  ;;  %v1509_v55 = vpop.f32.mrf.mxu1 }
 0x1a2   :  { %v1942_v25 = vpop.eup %1941  ;;  %v1884_v28 = vmul.f32 -1.442695, %v1508_v54 }
 0x1a3   :  { %v1944_v18 = vpop.eup %1943  ;;  %v1808_v37 = vmul.f32 16.0, %v1942_v25 }
 0x1a4   :  { %v1715_v58 = vadd.f32 1.0, %v1944_v18  ;;  %1953 = vpow2.f32 %v1884_v28 }
 0x1a5   :  { %1840 = vst [vmem:[%s3328_s4 + $0x28] sm:$0xff] %v1808_v37  ;;  %v1287_v59 = vpop.f32.mrf.mxu0  ;;  %v1512_v43 = vpop.f32.mrf.mxu1 }
 0x1a6   :  { %1955 = vrcp.f32 %v1715_v58  ;;  %v1946_v47 = vpop.eup %1945  ;;  %v1513_v24 = vadd.f32 %v1512_v43, %v1287_v59 }
 0x1a7   :  { %v1948_v1 = vpop.eup %1947  ;;  %v1809_v27 = vmul.f32 16.0, %v1946_v47  ;;  %v1289_v35 = vpop.f32.mrf.mxu0 }
 0x1a8   :  { %v1514_v56 = vpop.f32.mrf.mxu1  ;;  %v1716_v38 = vadd.f32 1.0, %v1948_v1  ;;  %v1885_v46 = vmul.f32 -1.442695, %v1513_v24 }
 0x1a9   :  { %1841 = vst [vmem:[%s3328_s4 + $0x30] sm:$0xff] %v1809_v27 }
 0x1aa   :  { %1957 = vrcp.f32 %v1716_v38  ;;  %v1292_v9 = vpop.f32.mrf.mxu0  ;;  %v1517_v20 = vpop.f32.mrf.mxu1 }
 0x1ab   :  { %1959 = vpow2.f32 %v1885_v46  ;;  %v1518_v63 = vadd.f32 %v1517_v20, %v1292_v9 }
 0x1ac   :  { %v1950_v0 = vpop.eup %1949  ;;  %v1294_v50 = vpop.f32.mrf.mxu0 }
 0x1ad   :  { %v1519_v10 = vpop.f32.mrf.mxu1  ;;  %v1952_v32 = vpop.eup %1951  ;;  %v1810_v4 = vmul.f32 16.0, %v1950_v0  ;;  %v1886_v5 = vmul.f32 -1.442695, %v1518_v63 }
 0x1ae   :  { %v1717_v34 = vadd.f32 1.0, %v1952_v32 }
 0x1af   :  { %1842 = vst [vmem:[%s3328_s4 + $0x38] sm:$0xff] %v1810_v4  ;;  %1961 = vpow2.f32 %v1886_v5 }
 0x1b0   :  { %1963 = vrcp.f32 %v1717_v34  ;;  %v1297_v33 = vpop.f32.mrf.mxu0  ;;  %v1522_v60 = vpop.f32.mrf.mxu1 }
 0x1b1   :  { %v1954_v11 = vpop.eup %1953  ;;  %v1523_v29 = vadd.f32 %v1522_v60, %v1297_v33 }
 0x1b2   :  { %v1718_v42 = vadd.f32 1.0, %v1954_v11  ;;  %v1299_v61 = vpop.f32.mrf.mxu0  ;;  %v1524_v6 = vpop.f32.mrf.mxu1 }
 0x1b3   :  { %v1956_v40 = vpop.eup %1955  ;;  %v1887_v8 = vmul.f32 -1.442695, %v1523_v29 }
 0x1b4   :  { %v1811_v14 = vmul.f32 16.0, %v1956_v40  ;;  %1965 = vrcp.f32 %v1718_v42 }
 0x1b5   :  { %1967 = vpow2.f32 %v1887_v8  ;;  %v1302_v39 = vpop.f32.mrf.mxu0  ;;  %v1527_v44 = vpop.f32.mrf.mxu1 }
 0x1b6   :  { %1843 = vst [vmem:[%s3328_s4 + $0x40] sm:$0xff] %v1811_v14  ;;  %v1528_v16 = vadd.f32 %v1527_v44, %v1302_v39 }
 0x1b7   :  { %v1958_v41 = vpop.eup %1957  ;;  %v1304_v21 = vpop.f32.mrf.mxu0 }
 0x1b8   :  { %v1529_v13 = vpop.f32.mrf.mxu1  ;;  %v1960_v19 = vpop.eup %1959  ;;  %v1812_v17 = vmul.f32 16.0, %v1958_v41  ;;  %v1888_v45 = vmul.f32 -1.442695, %v1528_v16 }
 0x1b9   :  { %v1719_v15 = vadd.f32 1.0, %v1960_v19 }
 0x1ba   :  { %1844 = vst [vmem:[%s3328_s4 + $0x48] sm:$0xff] %v1812_v17  ;;  %1969 = vpow2.f32 %v1888_v45 }
 0x1bb   :  { %1971 = vrcp.f32 %v1719_v15  ;;  %v1307_v36 = vpop.f32.mrf.mxu0  ;;  %v1532_v31 = vpop.f32.mrf.mxu1 }
 0x1bc   :  { %v1962_v3 = vpop.eup %1961  ;;  %v1533_v2 = vadd.f32 %v1532_v31, %v1307_v36 }
 0x1bd   :  { %v1964_v23 = vpop.eup %1963  ;;  %v1720_v48 = vadd.f32 1.0, %v1962_v3  ;;  %v1309_v49 = vpop.f32.mrf.mxu0 }
 0x1be   :  { %v1534_v57 = vpop.f32.mrf.mxu1  ;;  %v1813_v26 = vmul.f32 16.0, %v1964_v23  ;;  %v1889_v30 = vmul.f32 -1.442695, %v1533_v2 }
 0x1bf   :  { %1973 = vrcp.f32 %v1720_v48 }
 0x1c0   :  { %1845 = vst [vmem:[%s3328_s4 + $0x50] sm:$0xff] %v1813_v26  ;;  %1975 = vpow2.f32 %v1889_v30  ;;  %v1312_v12 = vpop.f32.mrf.mxu0  ;;  %v1537_v53 = vpop.f32.mrf.mxu1 }
 0x1c1   :  { %v1966_v22 = vpop.eup %1965  ;;  %v1538_v62 = vadd.f32 %v1537_v53, %v1312_v12 }
 0x1c2   :  { %v1968_v7 = vpop.eup %1967  ;;  %v1814_v51 = vmul.f32 16.0, %v1966_v22  ;;  %v1314_v54 = vpop.f32.mrf.mxu0 }
 0x1c3   :  { %v1539_v25 = vpop.f32.mrf.mxu1  ;;  %v1721_v52 = vadd.f32 1.0, %v1968_v7  ;;  %v1890_v55 = vmul.f32 -1.442695, %v1538_v62 }
 0x1c4   :  { %1846 = vst [vmem:[%s3328_s4 + $0x58] sm:$0xff] %v1814_v51 }
 0x1c5   :  { %1977 = vrcp.f32 %v1721_v52 }
 0x1c6   :  { %1979 = vpow2.f32 %v1890_v55  ;;  %v1317_v18 = vpop.f32.mrf.mxu0  ;;  %v1542_v37 = vpop.f32.mrf.mxu1 }
 0x1c7   :  { %v1970_v28 = vpop.eup %1969  ;;  %v1543_v58 = vadd.f32 %v1542_v37, %v1317_v18 }
 0x1c8   :  { %v1972_v59 = vpop.eup %1971  ;;  %v1722_v43 = vadd.f32 1.0, %v1970_v28  ;;  %v1319_v47 = vpop.f32.mrf.mxu0 }
 0x1c9   :  { %v1544_v24 = vpop.f32.mrf.mxu1  ;;  %v1815_v1 = vmul.f32 16.0, %v1972_v59  ;;  %v1891_v27 = vmul.f32 -1.442695, %v1543_v58 }
 0x1ca   :  { %1981 = vrcp.f32 %v1722_v43 }
 0x1cb   :  { %1847 = vst [vmem:[%s3328_s4 + $0x60] sm:$0xff] %v1815_v1  ;;  %1983 = vpow2.f32 %v1891_v27  ;;  %v1322_v35 = vpop.f32.mrf.mxu0  ;;  %v1547_v56 = vpop.f32.mrf.mxu1 }
 0x1cc   :  { %v1974_v38 = vpop.eup %1973  ;;  %v1548_v46 = vadd.f32 %v1547_v56, %v1322_v35 }
 0x1cd   :  { %v1976_v9 = vpop.eup %1975  ;;  %v1816_v20 = vmul.f32 16.0, %v1974_v38  ;;  %v1324_v63 = vpop.f32.mrf.mxu0 }
 0x1ce   :  { %v1549_v0 = vpop.f32.mrf.mxu1  ;;  %v1723_v50 = vadd.f32 1.0, %v1976_v9  ;;  %v1892_v10 = vmul.f32 -1.442695, %v1548_v46 }
 0x1cf   :  { %1848 = vst [vmem:[%s3328_s4 + $0x68] sm:$0xff] %v1816_v20 }
 0x1d0   :  { %1985 = vrcp.f32 %v1723_v50 }
 0x1d1   :  { %1987 = vpow2.f32 %v1892_v10  ;;  %v1327_v32 = vpop.f32.mrf.mxu0  ;;  %v1552_v4 = vpop.f32.mrf.mxu1 }
 0x1d2   :  { %v1978_v5 = vpop.eup %1977  ;;  %v1553_v34 = vadd.f32 %v1552_v4, %v1327_v32 }
 0x1d3   :  { %v1980_v33 = vpop.eup %1979  ;;  %v1817_v60 = vmul.f32 16.0, %v1978_v5  ;;  %v1329_v11 = vpop.f32.mrf.mxu0 }
 0x1d4   :  { %v1554_v29 = vpop.f32.mrf.mxu1  ;;  %v1724_v40 = vadd.f32 1.0, %v1980_v33  ;;  %v1893_v42 = vmul.f32 -1.442695, %v1553_v34 }
 0x1d5   :  { %1849 = vst [vmem:[%s3328_s4 + $0x70] sm:$0xff] %v1817_v60 }
 0x1d6   :  { %1989 = vrcp.f32 %v1724_v40  ;;  %v1332_v61 = vpop.f32.mrf.mxu0  ;;  %v1557_v6 = vpop.f32.mrf.mxu1 }
 0x1d7   :  { %v1982_v14 = vpop.eup %1981  ;;  %1991 = vpow2.f32 %v1893_v42  ;;  %v1558_v8 = vadd.f32 %v1557_v6, %v1332_v61 }
 0x1d8   :  { %v1984_v39 = vpop.eup %1983  ;;  %v1818_v44 = vmul.f32 16.0, %v1982_v14  ;;  %v1334_v16 = vpop.f32.mrf.mxu0 }
 0x1d9   :  { %v1559_v41 = vpop.f32.mrf.mxu1  ;;  %v1725_v21 = vadd.f32 1.0, %v1984_v39  ;;  %v1894_v13 = vmul.f32 -1.442695, %v1558_v8 }
 0x1da   :  { %1850 = vst [vmem:[%s3328_s4 + $0x78] sm:$0xff] %v1818_v44 }
 0x1db   :  { %1993 = vrcp.f32 %v1725_v21 }
 0x1dc   :  { %1995 = vpow2.f32 %v1894_v13  ;;  %v1337_v19 = vpop.f32.mrf.mxu0  ;;  %v1562_v17 = vpop.f32.mrf.mxu1 }
 0x1dd   :  { %v1986_v45 = vpop.eup %1985  ;;  %v1563_v15 = vadd.f32 %v1562_v17, %v1337_v19 }
 0x1de   :  { %v1988_v36 = vpop.eup %1987  ;;  %v1819_v31 = vmul.f32 16.0, %v1986_v45  ;;  %v1339_v3 = vpop.f32.mrf.mxu0 }
 0x1df   :  { %v1564_v2 = vpop.f32.mrf.mxu1  ;;  %v1726_v23 = vadd.f32 1.0, %v1988_v36  ;;  %v1895_v48 = vmul.f32 -1.442695, %v1563_v15 }
 0x1e0   :  { %1851 = vst [vmem:[%s3328_s4 + $0x80] sm:$0xff] %v1819_v31 }
 0x1e1   :  { %1997 = vrcp.f32 %v1726_v23  ;;  %v1342_v49 = vpop.f32.mrf.mxu0  ;;  %v1567_v57 = vpop.f32.mrf.mxu1 }
 0x1e2   :  { %1999 = vpow2.f32 %v1895_v48  ;;  %v1568_v26 = vadd.f32 %v1567_v57, %v1342_v49 }
 0x1e3   :  { %v1990_v30 = vpop.eup %1989  ;;  %v1344_v12 = vpop.f32.mrf.mxu0 }
 0x1e4   :  { %v1569_v53 = vpop.f32.mrf.mxu1  ;;  %v1992_v22 = vpop.eup %1991  ;;  %v1820_v62 = vmul.f32 16.0, %v1990_v30  ;;  %v1896_v7 = vmul.f32 -1.442695, %v1568_v26 }
 0x1e5   :  { %v1727_v51 = vadd.f32 1.0, %v1992_v22 }
 0x1e6   :  { %1852 = vst [vmem:[%s3328_s4 + $0x88] sm:$0xff] %v1820_v62  ;;  %2001 = vpow2.f32 %v1896_v7 }
 0x1e7   :  { %2003 = vrcp.f32 %v1727_v51  ;;  %v1347_v54 = vpop.f32.mrf.mxu0  ;;  %v1572_v25 = vpop.f32.mrf.mxu1 }
 0x1e8   :  { %v1994_v52 = vpop.eup %1993  ;;  %v1573_v55 = vadd.f32 %v1572_v25, %v1347_v54 }
 0x1e9   :  { %v1996_v18 = vpop.eup %1995  ;;  %v1821_v37 = vmul.f32 16.0, %v1994_v52  ;;  %v1349_v28 = vpop.f32.mrf.mxu0 }
 0x1ea   :  { %v1574_v58 = vpop.f32.mrf.mxu1  ;;  %v1728_v59 = vadd.f32 1.0, %v1996_v18  ;;  %v1897_v43 = vmul.f32 -1.442695, %v1573_v55 }
 0x1eb   :  { %1853 = vst [vmem:[%s3328_s4 + $0x90] sm:$0xff] %v1821_v37 }
 0x1ec   :  { %2005 = vrcp.f32 %v1728_v59  ;;  %v1352_v47 = vpop.f32.mrf.mxu0  ;;  %v1577_v24 = vpop.f32.mrf.mxu1 }
 0x1ed   :  { %2007 = vpow2.f32 %v1897_v43  ;;  %v1578_v1 = vadd.f32 %v1577_v24, %v1352_v47 }
 0x1ee   :  { %v1998_v27 = vpop.eup %1997  ;;  %v1354_v35 = vpop.f32.mrf.mxu0 }
 0x1ef   :  { %v1579_v56 = vpop.f32.mrf.mxu1  ;;  %v2000_v38 = vpop.eup %1999  ;;  %v1822_v46 = vmul.f32 16.0, %v1998_v27  ;;  %v1898_v9 = vmul.f32 -1.442695, %v1578_v1 }
 0x1f0   :  { %v1729_v20 = vadd.f32 1.0, %v2000_v38 }
 0x1f1   :  { %1854 = vst [vmem:[%s3328_s4 + $0x98] sm:$0xff] %v1822_v46  ;;  %2009 = vpow2.f32 %v1898_v9 }
 0x1f2   :  { %2011 = vrcp.f32 %v1729_v20  ;;  %v1357_v63 = vpop.f32.mrf.mxu0  ;;  %v1582_v0 = vpop.f32.mrf.mxu1 }
 0x1f3   :  { %v2002_v50 = vpop.eup %2001  ;;  %v1583_v10 = vadd.f32 %v1582_v0, %v1357_v63 }
 0x1f4   :  { %v2004_v32 = vpop.eup %2003  ;;  %v1730_v4 = vadd.f32 1.0, %v2002_v50  ;;  %v1359_v5 = vpop.f32.mrf.mxu0 }
 0x1f5   :  { %v1584_v34 = vpop.f32.mrf.mxu1  ;;  %v1823_v33 = vmul.f32 16.0, %v2004_v32  ;;  %v1899_v60 = vmul.f32 -1.442695, %v1583_v10 }
 0x1f6   :  { %2013 = vrcp.f32 %v1730_v4 }
 0x1f7   :  { %1855 = vst [vmem:[%s3328_s4 + $0xa0] sm:$0xff] %v1823_v33  ;;  %2015 = vpow2.f32 %v1899_v60  ;;  %v1362_v11 = vpop.f32.mrf.mxu0  ;;  %v1587_v29 = vpop.f32.mrf.mxu1 }
 0x1f8   :  { %v1588_v40 = vadd.f32 %v1587_v29, %v1362_v11 }
 0x1f9   :  { %v2006_v42 = vpop.eup %2005  ;;  %v1364_v61 = vpop.f32.mrf.mxu0 }
 0x1fa   :  { %v1589_v6 = vpop.f32.mrf.mxu1  ;;  %v2008_v14 = vpop.eup %2007  ;;  %v1824_v8 = vmul.f32 16.0, %v2006_v42  ;;  %v1900_v39 = vmul.f32 -1.442695, %v1588_v40 }
 0x1fb   :  { %v1731_v44 = vadd.f32 1.0, %v2008_v14 }
 0x1fc   :  { %1856 = vst [vmem:[%s3328_s4 + $0xa8] sm:$0xff] %v1824_v8  ;;  %2017 = vpow2.f32 %v1900_v39 }
 0x1fd   :  { %2019 = vrcp.f32 %v1731_v44  ;;  %v1367_v16 = vpop.f32.mrf.mxu0  ;;  %v1592_v41 = vpop.f32.mrf.mxu1 }
 0x1fe   :  { %v2010_v21 = vpop.eup %2009  ;;  %v1593_v13 = vadd.f32 %v1592_v41, %v1367_v16 }
 0x1ff   :  { %v2012_v19 = vpop.eup %2011  ;;  %v1732_v17 = vadd.f32 1.0, %v2010_v21  ;;  %v1369_v45 = vpop.f32.mrf.mxu0 }
 0x200   :  { %v1594_v15 = vpop.f32.mrf.mxu1  ;;  %v1825_v36 = vmul.f32 16.0, %v2012_v19  ;;  %v1901_v31 = vmul.f32 -1.442695, %v1593_v13 }
 0x201   :  { %2021 = vrcp.f32 %v1732_v17 }
 0x202   :  { %1857 = vst [vmem:[%s3328_s4 + $0xb0] sm:$0xff] %v1825_v36  ;;  %2023 = vpow2.f32 %v1901_v31 }
 0x203   :  { %v2014_v3 = vpop.eup %2013  ;;  %v1372_v2 = vpop.f32.mrf.mxu0 }
 0x204   :  { %v1597_v23 = vpop.f32.mrf.mxu1  ;;  %v2016_v48 = vpop.eup %2015  ;;  %v1826_v49 = vmul.f32 16.0, %v2014_v3 }
 0x205   :  { %v1598_v57 = vadd.f32 %v1597_v23, %v1372_v2  ;;  %v1733_v26 = vadd.f32 1.0, %v2016_v48  ;;  %v1374_v30 = vpop.f32.mrf.mxu0 }
 0x206   :  { %v1599_v12 = vpop.f32.mrf.mxu1  ;;  %1858 = vst [vmem:[%s3328_s4 + $0xb8] sm:$0xff] %v1826_v49 }
 0x207   :  { %v1902_v53 = vmul.f32 -1.442695, %v1598_v57  ;;  %2025 = vrcp.f32 %v1733_v26  ;;  %v1377_v22 = vpop.f32.mrf.mxu0 }
 0x208   :  { %v1602_v62 = vpop.f32.mrf.mxu1 }
 0x209   :  { %2027 = vpow2.f32 %v1902_v53  ;;  %v1603_v7 = vadd.f32 %v1602_v62, %v1377_v22  ;;  %v2018_v51 = vpop.eup %2017  ;;  %v1379_v54 = vpop.f32.mrf.mxu0 }
 0x20a   :  { %v1604_v25 = vpop.f32.mrf.mxu1  ;;  %v2020_v52 = vpop.eup %2019  ;;  %v1734_v55 = vadd.f32 1.0, %v2018_v51 }
 0x20b   :  { %v1903_v18 = vmul.f32 -1.442695, %v1603_v7  ;;  %v1827_v37 = vmul.f32 16.0, %v2020_v52  ;;  %v1382_v28 = vpop.f32.mrf.mxu0 }
 0x20c   :  { %v1607_v58 = vpop.f32.mrf.mxu1  ;;  %2029 = vrcp.f32 %v1734_v55 }
 0x20d   :  { %v1608_v59 = vadd.f32 %v1607_v58, %v1382_v28  ;;  %1859 = vst [vmem:[%s3328_s4 + $0xc0] sm:$0xff] %v1827_v37  ;;  %2031 = vpow2.f32 %v1903_v18  ;;  %v1384_v43 = vpop.f32.mrf.mxu0 }
 0x20e   :  { %v1609_v47 = vpop.f32.mrf.mxu1  ;;  %v2022_v24 = vpop.eup %2021 }
 0x20f   :  { %v1904_v1 = vmul.f32 -1.442695, %v1608_v59  ;;  %v2024_v27 = vpop.eup %2023  ;;  %v1828_v35 = vmul.f32 16.0, %v2022_v24 }
 0x210   :  { %v1735_v56 = vadd.f32 1.0, %v2024_v27 }
 0x211   :  { %2033 = vpow2.f32 %v1904_v1  ;;  %1860 = vst [vmem:[%s3328_s4 + $0xc8] sm:$0xff] %v1828_v35 }
 0x212   :  { %2035 = vrcp.f32 %v1735_v56 }
 0x214   :  { %v2026_v38 = vpop.eup %2025 }
 0x215   :  { %v1829_v9 = vmul.f32 16.0, %v2026_v38 }
 0x216   :  { %v2028_v46 = vpop.eup %2027 }
 0x217   :  { %v1736_v20 = vadd.f32 1.0, %v2028_v46  ;;  %1861 = vst [vmem:[%s3328_s4 + $0xd0] sm:$0xff] %v1829_v9 }
 0x219   :  { %2037 = vrcp.f32 %v1736_v20  ;;  %v2030_v63 = vpop.eup %2029 }
 0x21a   :  { %v2032_v0 = vpop.eup %2031  ;;  %v1830_v50 = vmul.f32 16.0, %v2030_v63 }
 0x21b   :  { %v1737_v10 = vadd.f32 1.0, %v2032_v0 }
 0x21c   :  { %1862 = vst [vmem:[%s3328_s4 + $0xd8] sm:$0xff] %v1830_v50 }
 0x21d   :  { %2039 = vrcp.f32 %v1737_v10 }
 0x21e   :  { %v2034_v32 = vpop.eup %2033 }
 0x21f   :  { %v1738_v4 = vadd.f32 1.0, %v2034_v32  ;;  %v2036_v5 = vpop.eup %2035 }
 0x220   :  { %v1831_v34 = vmul.f32 16.0, %v2036_v5 }
 0x221   :  { %2041 = vrcp.f32 %v1738_v4 }
 0x222   :  { %1863 = vst [vmem:[%s3328_s4 + $0xe0] sm:$0xff] %v1831_v34 }
 0x226   :  { %v2038_v33 = vpop.eup %2037 }
 0x227   :  { %v1832_v60 = vmul.f32 16.0, %v2038_v33 }
 0x229   :  { %1864 = vst [vmem:[%s3328_s4 + $0xe8] sm:$0xff] %v1832_v60 }
 0x22a   :  { %v2040_v11 = vpop.eup %2039 }
 0x22b   :  { %v1833_v29 = vmul.f32 16.0, %v2040_v11 }
 0x22d   :  { %1865 = vst [vmem:[%s3328_s4 + $0xf0] sm:$0xff] %v1833_v29 }
 0x22e   :  { %v2042_v40 = vpop.eup %2041 }
 0x22f   :  { %v1834_v42 = vmul.f32 16.0, %v2042_v40 }
 0x231   :  { %1866 = vst [vmem:[%s3328_s4 + $0xf8] sm:$0xff] %v1834_v42 }
 0x232   :  { %1871 = vsyncpa [#allocation3], 1 }
 0x233   :  { %1872 = vsyncpa [#allocation5], 1 }

// kernel: tile.8
= control target key start
LH: loop header
LB: loop body
LE: loop exit
PB: predicated region body
PF: predicated region fallthrough
CT: control target
= control target key end

     0   :  { %s22_s0 = inlined_call_operand.vmem [shape: f32[4], index: 0, kind: input, shape index: {}]   ;;  %s23_s1 = inlined_call_operand.vmem [shape: f32[4,4], index: 1, kind: output, shape index: {}]  }
   0x1   :  { %v4_v0 = vld [vmem:[%s22_s0] ss:$0 sm:$0xff] }
   0x2   :  { %5 = vst [vmem:[%s23_s1] sm:$0xf] %v4_v0 }

// kernel: tile.0
= control target key start
LH: loop header
LB: loop body
LE: loop exit
PB: predicated region body
PF: predicated region fallthrough
CT: control target
= control target key end

     0   :  { %s35_s8 = smov 125   ;;  %vm8_vm0 = vcmask 7168   ;;  %s36_s11 = smov 126   ;;  %s62_s0 = inlined_call_operand.vmem [shape: f32[4,4], index: 0, kind: input, shape index: {}]   ;;  %s63_s1 = inlined_call_operand.vmem [shape: f32[16,1], index: 1, kind: output, shape index: {}]  }
   0x1   :  { %v5_v0 = vld [vmem:[%s62_s0] sm:$0xf]  ;;  %s34_s0 = smov 127  }
   0x2   :  { %6 = vst [vmem:[#allocation0] sm:$0xf] %v5_v0 }
   0x9   :  { %v10_v1 = vld [vmem:[#allocation0] sm:$0xf]  }
   0xa   :  { %v22_v2 = vld [vmem:[#allocation0] sm:$0xf]   ;;  %11 = vrot.lane.b32.xlu0 %v10_v1, %s34_s0 }
   0xb   :  { %23 = vrot.lane.b32.xlu1 %v22_v2, %s35_s8  ;;  %v7_v3 = vld [vmem:[#allocation0] sm:$0xf]  }
   0xc   :  { %v16_v4 = vld [vmem:[#allocation0] sm:$0xf]   ;;  %9 = vst.msk [vmem:[%s63_s1] ss:$4 sm:$0xf] %vm8_vm0, %v7_v3  }
   0xe   :  { %17 = vrot.lane.b32.xlu0 %v16_v4, %s36_s11 }
  0x7c   :  { %v12_v5 = vpop.permute.xlu0 %11  }
  0x7d   :  { %v24_v6 = vpop.permute.xlu1 %23   ;;  %28 = vst.msk [vmem:[%s63_s1 + $0x1] ss:$4 sm:$0xf] %vm8_vm0, %v12_v5  }
  0x7e   :  { %30 = vst.msk [vmem:[%s63_s1 + $0x3] ss:$4 sm:$0xf] %vm8_vm0, %v24_v6  }
  0x80   :  { %v18_v7 = vpop.permute.xlu0 %17  }
  0x81   :  { %29 = vst.msk [vmem:[%s63_s1 + $0x2] ss:$4 sm:$0xf] %vm8_vm0, %v18_v7  }

// kernel: affine_transform_forward.3
= control target key start
LH: loop header
LB: loop body
LE: loop exit
PB: predicated region body
PF: predicated region fallthrough
CT: control target
= control target key end

     0   :  { %s633_s12 = smov 0   ;;  %s635_s13 = smov 0   ;;  %s933_s0 = inlined_call_operand.vmem [shape: f32[16,1], index: 0, kind: input, shape index: {}]   ;;  %s934_s1 = inlined_call_operand.vmem [shape: f32[32,4096], index: 1, kind: input, shape index: {}, may-alias: {1,3}]   ;;  %s935_s2 = inlined_call_operand.vmem [shape: f32[16,4096], index: 2, kind: input, shape index: {}]   ;;  %s936_s3 = inlined_call_operand.vmem [shape: f32[32,4096], index: 3, kind: output, shape index: {}, may-alias: {1,3}]  }
   0x1   :  { %s637_s14 = smov 0   ;;  %s639_s15 = smov 0  }
   0x2   :  { %s641_s16 = smov 0  }
   0x3 LB: > { %s22_s17 = sadd.s32 1, %s602_s14  ;;  %s25_s18 = sadd.s32 1, %s606_s15  ;;  %s610_s16 = sphi %s641_s16, %s13_s16   ;;  %s606_s15 = sphi %s639_s15, %s940_s15   ;;  %s602_s14 = sphi %s637_s14, %s939_s14   ;;  %s598_s13 = sphi %s635_s13, %s938_s13   ;;  %s594_s12 = sphi %s633_s12, %s937_s12  }
   0x4   : > { %p23_p0 = scmp.ge.s32.totalorder %s22_s17, 2  ;;  %p515_p1 = scmp.ge.s32.totalorder %s610_s16, 1 }
   0x5   : > { %p180_p2 = scmp.lt.s32.totalorder %s610_s16, 5 }
   0x6   : > { %s942_s17 = smov (%p23_p0, %s22_s17), 0  ;;  %s944_s18 = smov (!%p23_p0, %s25_s18), %s606_s15 }
   0x7   : > { %p181_p3 = pnand %p515_p1, %p180_p2  ;;  %p27_p4 = scmp.ge.s32.totalorder %s944_s18, 2 }
   0x8   : > { %p217_p5 = scmp.lt.s32.totalorder (!%p181_p3), %s598_s13, 1  ;;  %s517_s24 = sshll.u32 (!%p181_p3), %s594_s12, 1 }
   0x9   : > { %s946_s18 = smov (%p27_p4, %s944_s18), 0  ;;  %184 = sbr.rel (%p181_p3) target bundleno = 170 (0xaa), region = 32 }
   0xa   : > { %s222_s25 = sadd.s32 (!%p181_p3), %s598_s13, %s517_s24 }
   0xb   : > { %p223_p6 = scmp.lt.s32.totalorder (!%p181_p3), %s222_s25, 3 }
   0xe   : > { %v612_v0 = vmov 0   ;;  %s663_s19 = scalar_select %p217_p5, %s598_s13, 1 }
   0xf   : > { %571 = vset.pattern.permute.xlu0 %v612_v0  ;;  %s948_s25 = smov (!%p223_p6, %s222_s25), 3 }
  0x10   : > { %s516_s20 = sshll.u32 %s663_s19, 3  ;;  %s527_s26 = sshll.u32 %s948_s25, 8 }
  0x11   : > { %s220_s23 = scalar_lea.vmem %s933_s0, %s516_s20  ;;  %s677_s29 = scalar_lea.vmem %s934_s1, %s527_s26 }
  0x12   : > { %v276_v1 = vld [vmem:[%s220_s23] sm:$0xff]  ;;  %v245_v3 = vld [vmem:[%s677_s29 + $0x8] sm:$0xff]  ;;  %v246_v4 = vld [vmem:[%s677_s29 + $0x10] sm:$0xff]  ;;  %s528_s30 = sshll.u32 %s663_s19, 8  ;;  %s822_s9 = scalar_lea.vmem %s936_s3, %s527_s26 }
  0x13   : > { %279 = vperm.xlu0 %571, %v276_v1   ;;  %v244_v2 = vld [vmem:[%s677_s29] sm:$0xff]  ;;  %v247_v5 = vld [vmem:[%s677_s29 + $0x18] sm:$0xff]  ;;  %v249_v7 = vld [vmem:[%s677_s29 + $0x28] sm:$0xff]  ;;  %s702_s6 = scalar_lea.vmem %s935_s2, %s528_s30 }
  0x14   : > { %v248_v6 = vld [vmem:[%s677_s29 + $0x20] sm:$0xff]  ;;  %v250_v8 = vld [vmem:[%s677_s29 + $0x30] sm:$0xff]  ;;  %v251_v9 = vld [vmem:[%s677_s29 + $0x38] sm:$0xff] }
  0x15   : > { %v252_v10 = vld [vmem:[%s677_s29 + $0x40] sm:$0xff]  ;;  %v253_v11 = vld [vmem:[%s677_s29 + $0x48] sm:$0xff]  ;;  %v254_v12 = vld [vmem:[%s677_s29 + $0x50] sm:$0xff] }
  0x16   : > { %v255_v13 = vld [vmem:[%s677_s29 + $0x58] sm:$0xff]  ;;  %v256_v14 = vld [vmem:[%s677_s29 + $0x60] sm:$0xff]  ;;  %v257_v15 = vld [vmem:[%s677_s29 + $0x68] sm:$0xff] }
  0x17   : > { %v258_v16 = vld [vmem:[%s677_s29 + $0x70] sm:$0xff]  ;;  %v259_v17 = vld [vmem:[%s677_s29 + $0x78] sm:$0xff]  ;;  %v260_v18 = vld [vmem:[%s677_s29 + $0x80] sm:$0xff] }
  0x18   : > { %v261_v20 = vld [vmem:[%s677_s29 + $0x88] sm:$0xff]  ;;  %v262_v21 = vld [vmem:[%s677_s29 + $0x90] sm:$0xff]  ;;  %v263_v22 = vld [vmem:[%s677_s29 + $0x98] sm:$0xff] }
  0x19   : > { %v264_v27 = vld [vmem:[%s677_s29 + $0xa0] sm:$0xff]  ;;  %v265_v28 = vld [vmem:[%s677_s29 + $0xa8] sm:$0xff]  ;;  %v266_v29 = vld [vmem:[%s677_s29 + $0xb0] sm:$0xff] }
  0x1a   : > { %v267_v34 = vld [vmem:[%s677_s29 + $0xb8] sm:$0xff]  ;;  %v268_v35 = vld [vmem:[%s677_s29 + $0xc0] sm:$0xff]  ;;  %v269_v36 = vld [vmem:[%s677_s29 + $0xc8] sm:$0xff] }
  0x1b   : > { %v270_v41 = vld [vmem:[%s677_s29 + $0xd0] sm:$0xff]  ;;  %v271_v42 = vld [vmem:[%s677_s29 + $0xd8] sm:$0xff]  ;;  %v272_v43 = vld [vmem:[%s677_s29 + $0xe0] sm:$0xff] }
  0x1c   : > { %v314_v44 = vld [vmem:[%s702_s6] sm:$0xff]  ;;  %v315_v45 = vld [vmem:[%s702_s6 + $0x8] sm:$0xff]  ;;  %v316_v46 = vld [vmem:[%s702_s6 + $0x10] sm:$0xff] }
  0x1d   : > { %v317_v47 = vld [vmem:[%s702_s6 + $0x18] sm:$0xff]  ;;  %v273_v52 = vld [vmem:[%s677_s29 + $0xe8] sm:$0xff]  ;;  %v274_v53 = vld [vmem:[%s677_s29 + $0xf0] sm:$0xff] }
  0x1e   : > { %v275_v54 = vld [vmem:[%s677_s29 + $0xf8] sm:$0xff]  ;;  %v318_v55 = vld [vmem:[%s702_s6 + $0x20] sm:$0xff]  ;;  %v319_v56 = vld [vmem:[%s702_s6 + $0x28] sm:$0xff] }
  0x1f   : > { %v320_v57 = vld [vmem:[%s702_s6 + $0x30] sm:$0xff]  ;;  %v321_v58 = vld [vmem:[%s702_s6 + $0x38] sm:$0xff]  ;;  %v322_v63 = vld [vmem:[%s702_s6 + $0x40] sm:$0xff] }
  0x20   : > { %v323_v0 = vld [vmem:[%s702_s6 + $0x48] sm:$0xff]  ;;  %v324_v1 = vld [vmem:[%s702_s6 + $0x50] sm:$0xff] }
  0x8e   : > { %v697_v19 = vpop.permute.xlu0 %279 }
  0x8f   : > { %v708_v23 = vmul.f32 %v697_v19, %v244_v2  ;;  %v711_v24 = vmul.f32 %v697_v19, %v245_v3  ;;  %v714_v25 = vmul.f32 %v697_v19, %v246_v4  ;;  %v717_v26 = vmul.f32 %v697_v19, %v247_v5 }
  0x90   : > { %v723_v30 = vmul.f32 %v697_v19, %v248_v6  ;;  %v726_v31 = vmul.f32 %v697_v19, %v249_v7  ;;  %v729_v32 = vmul.f32 %v697_v19, %v250_v8  ;;  %v732_v33 = vmul.f32 %v697_v19, %v251_v9  ;;  %v325_v6 = vld [vmem:[%s702_s6 + $0x58] sm:$0xff]  ;;  %v326_v7 = vld [vmem:[%s702_s6 + $0x60] sm:$0xff]  ;;  %v327_v8 = vld [vmem:[%s702_s6 + $0x68] sm:$0xff] }
  0x91   : > { %v738_v37 = vmul.f32 %v697_v19, %v252_v10  ;;  %v741_v38 = vmul.f32 %v697_v19, %v253_v11  ;;  %v744_v39 = vmul.f32 %v697_v19, %v254_v12  ;;  %v747_v40 = vmul.f32 %v697_v19, %v255_v13  ;;  %v328_v13 = vld [vmem:[%s702_s6 + $0x70] sm:$0xff] }
  0x92   : > { %v757_v48 = vmul.f32 %v697_v19, %v256_v14  ;;  %v760_v49 = vmul.f32 %v697_v19, %v257_v15  ;;  %v763_v50 = vmul.f32 %v697_v19, %v258_v16  ;;  %v766_v51 = vmul.f32 %v697_v19, %v259_v17  ;;  %v329_v14 = vld [vmem:[%s702_s6 + $0x78] sm:$0xff]  ;;  %v330_v15 = vld [vmem:[%s702_s6 + $0x80] sm:$0xff] }
  0x93   : > { %v776_v59 = vmul.f32 %v697_v19, %v260_v18  ;;  %v779_v60 = vmul.f32 %v697_v19, %v261_v20  ;;  %v782_v61 = vmul.f32 %v697_v19, %v262_v21  ;;  %v785_v62 = vmul.f32 %v697_v19, %v263_v22  ;;  %v331_v21 = vld [vmem:[%s702_s6 + $0x88] sm:$0xff]  ;;  %v332_v22 = vld [vmem:[%s702_s6 + $0x90] sm:$0xff] }
  0x94   : > { %v791_v2 = vmul.f32 %v697_v19, %v264_v27  ;;  %v794_v3 = vmul.f32 %v697_v19, %v265_v28  ;;  %v797_v4 = vmul.f32 %v697_v19, %v266_v29  ;;  %v800_v5 = vmul.f32 %v697_v19, %v267_v34  ;;  %v333_v27 = vld [vmem:[%s702_s6 + $0x98] sm:$0xff] }
  0x95   : > { %v806_v9 = vmul.f32 %v697_v19, %v268_v35  ;;  %v809_v10 = vmul.f32 %v697_v19, %v269_v36  ;;  %v812_v11 = vmul.f32 %v697_v19, %v270_v41  ;;  %v815_v12 = vmul.f32 %v697_v19, %v271_v42  ;;  %v334_v36 = vld [vmem:[%s702_s6 + $0xa0] sm:$0xff]  ;;  %v335_v41 = vld [vmem:[%s702_s6 + $0xa8] sm:$0xff] }
  0x96   : > { %v828_v16 = vmul.f32 %v697_v19, %v272_v43  ;;  %v831_v17 = vmul.f32 %v697_v19, %v273_v52  ;;  %v834_v18 = vmul.f32 %v697_v19, %v274_v53  ;;  %v837_v20 = vmul.f32 %v697_v19, %v275_v54  ;;  %v336_v19 = vld [vmem:[%s702_s6 + $0xb0] sm:$0xff]  ;;  %v343_v52 = vld [vmem:[%s702_s6 + $0xe8] sm:$0xff]  ;;  %v345_v54 = vld [vmem:[%s702_s6 + $0xf8] sm:$0xff] }
  0x97   : > { %v346_v28 = vadd.f32 %v314_v44, %v708_v23  ;;  %v347_v29 = vadd.f32 %v315_v45, %v711_v24  ;;  %v348_v34 = vadd.f32 %v316_v46, %v714_v25  ;;  %v349_v35 = vadd.f32 %v317_v47, %v717_v26  ;;  %v337_v25 = vld [vmem:[%s702_s6 + $0xb8] sm:$0xff]  ;;  %v338_v44 = vld [vmem:[%s702_s6 + $0xc0] sm:$0xff]  ;;  %v339_v26 = vld [vmem:[%s702_s6 + $0xc8] sm:$0xff] }
  0x98   : > { %v350_v42 = vadd.f32 %v318_v55, %v723_v30  ;;  %v351_v43 = vadd.f32 %v319_v56, %v726_v31  ;;  %v352_v23 = vadd.f32 %v320_v57, %v729_v32  ;;  %v353_v24 = vadd.f32 %v321_v58, %v732_v33  ;;  %v340_v32 = vld [vmem:[%s702_s6 + $0xd0] sm:$0xff]  ;;  %v341_v33 = vld [vmem:[%s702_s6 + $0xd8] sm:$0xff]  ;;  %v342_v47 = vld [vmem:[%s702_s6 + $0xe0] sm:$0xff] }
  0x99   : > { %v354_v45 = vadd.f32 %v322_v63, %v738_v37  ;;  %v355_v46 = vadd.f32 %v323_v0, %v741_v38  ;;  %v356_v30 = vadd.f32 %v324_v1, %v744_v39  ;;  %v357_v31 = vadd.f32 %v325_v6, %v747_v40  ;;  %378 = vst [vmem:[%s822_s9] sm:$0xff] %v346_v28  ;;  %v344_v53 = vld [vmem:[%s702_s6 + $0xf0] sm:$0xff] }
  0x9a   : > { %379 = vst [vmem:[%s822_s9 + $0x8] sm:$0xff] %v347_v29  ;;  %380 = vst [vmem:[%s822_s9 + $0x10] sm:$0xff] %v348_v34  ;;  %v358_v37 = vadd.f32 %v326_v7, %v757_v48  ;;  %v359_v38 = vadd.f32 %v327_v8, %v760_v49  ;;  %v360_v39 = vadd.f32 %v328_v13, %v763_v50 }
  0x9b   : > { %381 = vst [vmem:[%s822_s9 + $0x18] sm:$0xff] %v349_v35  ;;  %v361_v40 = vadd.f32 %v329_v14, %v766_v51  ;;  %382 = vst [vmem:[%s822_s9 + $0x20] sm:$0xff] %v350_v42  ;;  %v362_v48 = vadd.f32 %v330_v15, %v776_v59  ;;  %v363_v49 = vadd.f32 %v331_v21, %v779_v60 }
  0x9c   : > { %383 = vst [vmem:[%s822_s9 + $0x28] sm:$0xff] %v351_v43  ;;  %384 = vst [vmem:[%s822_s9 + $0x30] sm:$0xff] %v352_v23  ;;  %v364_v50 = vadd.f32 %v332_v22, %v782_v61  ;;  %v365_v55 = vadd.f32 %v333_v27, %v785_v62  ;;  %v366_v51 = vadd.f32 %v334_v36, %v791_v2 }
  0x9d   : > { %385 = vst [vmem:[%s822_s9 + $0x38] sm:$0xff] %v353_v24  ;;  %386 = vst [vmem:[%s822_s9 + $0x40] sm:$0xff] %v354_v45  ;;  %v367_v56 = vadd.f32 %v335_v41, %v794_v3  ;;  %v368_v57 = vadd.f32 %v336_v19, %v797_v4  ;;  %v369_v58 = vadd.f32 %v337_v25, %v800_v5 }
  0x9e   : > { %387 = vst [vmem:[%s822_s9 + $0x48] sm:$0xff] %v355_v46  ;;  %388 = vst [vmem:[%s822_s9 + $0x50] sm:$0xff] %v356_v30  ;;  %v370_v59 = vadd.f32 %v338_v44, %v806_v9  ;;  %v371_v60 = vadd.f32 %v339_v26, %v809_v10  ;;  %v372_v61 = vadd.f32 %v340_v32, %v812_v11 }
  0x9f   : > { %389 = vst [vmem:[%s822_s9 + $0x58] sm:$0xff] %v357_v31  ;;  %390 = vst [vmem:[%s822_s9 + $0x60] sm:$0xff] %v358_v37  ;;  %v373_v62 = vadd.f32 %v341_v33, %v815_v12  ;;  %v374_v63 = vadd.f32 %v342_v47, %v828_v16  ;;  %v375_v0 = vadd.f32 %v343_v52, %v831_v17 }
  0xa0   : > { %391 = vst [vmem:[%s822_s9 + $0x68] sm:$0xff] %v359_v38  ;;  %392 = vst [vmem:[%s822_s9 + $0x70] sm:$0xff] %v360_v39  ;;  %v376_v1 = vadd.f32 %v344_v53, %v834_v18  ;;  %v377_v2 = vadd.f32 %v345_v54, %v837_v20 }
  0xa1   : > { %393 = vst [vmem:[%s822_s9 + $0x78] sm:$0xff] %v361_v40  ;;  %394 = vst [vmem:[%s822_s9 + $0x80] sm:$0xff] %v362_v48 }
  0xa2   : > { %395 = vst [vmem:[%s822_s9 + $0x88] sm:$0xff] %v363_v49  ;;  %396 = vst [vmem:[%s822_s9 + $0x90] sm:$0xff] %v364_v50 }
  0xa3   : > { %397 = vst [vmem:[%s822_s9 + $0x98] sm:$0xff] %v365_v55  ;;  %398 = vst [vmem:[%s822_s9 + $0xa0] sm:$0xff] %v366_v51 }
  0xa4   : > { %399 = vst [vmem:[%s822_s9 + $0xa8] sm:$0xff] %v367_v56  ;;  %400 = vst [vmem:[%s822_s9 + $0xb0] sm:$0xff] %v368_v57 }
  0xa5   : > { %401 = vst [vmem:[%s822_s9 + $0xb8] sm:$0xff] %v369_v58  ;;  %402 = vst [vmem:[%s822_s9 + $0xc0] sm:$0xff] %v370_v59 }
  0xa6   : > { %403 = vst [vmem:[%s822_s9 + $0xc8] sm:$0xff] %v371_v60  ;;  %404 = vst [vmem:[%s822_s9 + $0xd0] sm:$0xff] %v372_v61 }
  0xa7   : > { %405 = vst [vmem:[%s822_s9 + $0xd8] sm:$0xff] %v373_v62  ;;  %406 = vst [vmem:[%s822_s9 + $0xe0] sm:$0xff] %v374_v63 }
  0xa8   : > { %407 = vst [vmem:[%s822_s9 + $0xe8] sm:$0xff] %v375_v0  ;;  %408 = vst [vmem:[%s822_s9 + $0xf0] sm:$0xff] %v376_v1 }
  0xa9   : > { %409 = vst [vmem:[%s822_s9 + $0xf8] sm:$0xff] %v377_v2 }
  0xaa PF: > { %s13_s16 = sadd.s32 1, %s610_s16   ;;  %s937_s12 = smov %s602_s14 }
  0xab   : > { %p10_p7 = scmp.ge.s32.totalorder %s13_s16, 6   ;;  %s938_s13 = smov %s606_s15 }
  0xac   : > { %s939_s14 = smov %s942_s17  ;;  %s940_s15 = smov %s946_s18 }
  0xad   :  { %12 = sbr.rel (!%p10_p7) target bundleno = 3 (0x3), region = 68 }

</bundles_post_ra>
